<compile_context>
chip_gen: v5e
topology: v5e:2x2
jax: 0.10.0
libtpu: 0.0.40
codegen_flags: <defaults>
</compile_context>

<pallas_src>
import jax
import jax.numpy as jnp
import numpy as np
from jax import lax
from jax.experimental import pallas as pl
from jax.experimental.pallas import tpu as pltpu

BN_EPS = 1e-5   # torch.nn.BatchNorm1d default eps
LANE = 128      # TPU lane width


def _round_up(x, m):
    return ((x + m - 1) // m) * m


def _pad_to(a, shape):
    return jnp.pad(a, [(0, t - s) for s, t in zip(a.shape, shape)])


# ---------------------------------------------------------------------------
# Shared GIN-stack body (used by both the split and the fused kernel)
# ---------------------------------------------------------------------------
def _gin_mlp(z_f32, w1, vec, w2):
    """Sequential(Linear, BatchNorm1d (training-mode batch stats), Tanh, Linear, Tanh)."""
    f32, bf16 = jnp.float32, jnp.bfloat16
    b1, gamma, beta, b2 = vec[0:1], vec[1:2], vec[2:3], vec[3:4]
    z1 = jnp.dot(z_f32.astype(bf16), w1, preferred_element_type=f32) + b1
    m = jnp.mean(z1, axis=0, keepdims=True)
    zc = z1 - m
    v = jnp.mean(zc * zc, axis=0, keepdims=True)          # centered (torch-style) biased var
    z1 = jnp.tanh(zc * (gamma * lax.rsqrt(v + BN_EPS)) + beta)
    z2 = jnp.dot(z1.astype(bf16), w2, preferred_element_type=f32) + b2
    return jnp.tanh(z2)


def _gin_timeblock(x_ref, adjI_ref, w10_ref, vec0_ref, w20_ref,
                   w1k_ref, veck_ref, w2k_ref, pool_ref, glw_ref, glb_ref):
    """Runs the per-timestep GIN stacks + global_add_pool + linear_gnn for the TB
    timesteps of this grid block.  The shared (adj+I) / pooling matmuls are
    batched across the block by concatenating timesteps along the lane axis.
    Returns TB arrays of shape (Bp, Op) in f32."""
    TB = x_ref.shape[0]
    Fp = x_ref.shape[2]
    L1 = w1k_ref.shape[1]
    Hp = w20_ref.shape[2]
    f32, bf16 = jnp.float32, jnp.bfloat16

    adjI = adjI_ref[...]          # (N, N)   bf16, exact small integers (self loop folded in)
    pool = pool_ref[...]          # (Bp, N)  bf16, exact 0/1
    glw = glw_ref[...]            # (Hp, Op) bf16
    glb = glb_ref[...]            # (1, Op)  f32

    def cat(parts):
        return parts[0] if len(parts) == 1 else jnp.concatenate(parts, axis=-1)

    # GIN layer 0: nn((adj + I) @ x), aggregation batched over the TB timesteps.
    agg = jnp.dot(adjI, cat([x_ref[s] for s in range(TB)]),
                  preferred_element_type=f32)                        # (N, TB*Fp)
    xs = [_gin_mlp(agg[:, s * Fp:(s + 1) * Fp],
                   w10_ref[s], vec0_ref[s], w20_ref[s]) for s in range(TB)]

    # Remaining GIN layers (hidden -> hidden), same batched aggregation.
    for l in range(L1):
        agg = jnp.dot(adjI, cat([x.astype(bf16) for x in xs]),
                      preferred_element_type=f32)                    # (N, TB*Hp)
        xs = [_gin_mlp(agg[:, s * Hp:(s + 1) * Hp],
                       w1k_ref[s, l], veck_ref[s, l], w2k_ref[s, l])
              for s in range(TB)]

    # global_add_pool (batched across timesteps) + per-timestep linear_gnn.
    pooled = jnp.dot(pool, cat([x.astype(bf16) for x in xs]),
                     preferred_element_type=f32)                     # (Bp, TB*Hp)
    return [jnp.dot(pooled[:, s * Hp:(s + 1) * Hp].astype(bf16), glw,
                    preferred_element_type=f32) + glb for s in range(TB)]


# ---------------------------------------------------------------------------
# Kernel A (split path, multi-TC chips): GIN stack -> h_all
# ---------------------------------------------------------------------------
def _gnn_block_kernel(x_ref, adjI_ref, w10_ref, vec0_ref, w20_ref,
                      w1k_ref, veck_ref, w2k_ref, pool_ref, glw_ref, glb_ref,
                      h_ref):
    hs = _gin_timeblock(x_ref, adjI_ref, w10_ref, vec0_ref, w20_ref,
                        w1k_ref, veck_ref, w2k_ref, pool_ref, glw_ref, glb_ref)
    for s, h in enumerate(hs):
        h_ref[s] = h                                   # lane-dense (Bp, Op=128) store


# ---------------------------------------------------------------------------
# Kernel B (split path): Elman RNN over seq + final Linear + sigmoid
# ---------------------------------------------------------------------------
def _rnn_head_kernel(h_ref, wih_ref, whh_ref, brnn_ref, lw_ref, lb_ref, out_ref):
    S, Bp, _ = h_ref.shape
    Rp = whh_ref.shape[0]
    f32, bf16 = jnp.float32, jnp.bfloat16
    wih, whh, brnn = wih_ref[...], whh_ref[...], brnn_ref[...]
    h = jnp.zeros((Bp, Rp), f32)
    for t in range(S):                                 # static unroll (S is small)
        h = jnp.tanh(jnp.dot(h_ref[t].astype(bf16), wih, preferred_element_type=f32)
                     + jnp.dot(h.astype(bf16), whh, preferred_element_type=f32)
                     + brnn)
    logits = jnp.dot(h, lw_ref[...], preferred_element_type=f32) + lb_ref[...]
    out_ref[...] = jax.nn.sigmoid(logits)


# ---------------------------------------------------------------------------
# Kernel C (fused path, single-TC chips): GIN stack + RNN head in one kernel
# ---------------------------------------------------------------------------
def _gnn_rnn_fused_kernel(x_ref, adjI_ref, w10_ref, vec0_ref, w20_ref,
                          w1k_ref, veck_ref, w2k_ref, pool_ref, glw_ref, glb_ref,
                          wih_ref, whh_ref, brnn_ref, lw_ref, lb_ref,
                          out_ref, hstate_ref):
    f32, bf16 = jnp.float32, jnp.bfloat16
    t = pl.program_id(0)

    @pl.when(t == 0)
    def _():
        hstate_ref[...] = jnp.zeros_like(hstate_ref)   # RNN hidden state carried in scratch

    hs = _gin_timeblock(x_ref, adjI_ref, w10_ref, vec0_ref, w20_ref,
                        w1k_ref, veck_ref, w2k_ref, pool_ref, glw_ref, glb_ref)

    wih, whh, brnn = wih_ref[...], whh_ref[...], brnn_ref[...]
    h = hstate_ref[...]
    for s in range(len(hs)):                           # static unroll over the seq block
        h = jnp.tanh(jnp.dot(hs[s].astype(bf16), wih, preferred_element_type=f32)
                     + jnp.dot(h.astype(bf16), whh, preferred_element_type=f32)
                     + brnn)
    hstate_ref[...] = h

    @pl.when(t == pl.num_programs(0) - 1)
    def _():
        logits = jnp.dot(h, lw_ref[...], preferred_element_type=f32) + lb_ref[...]
        out_ref[...] = jax.nn.sigmoid(logits)


# ---------------------------------------------------------------------------
# Wrapper
# ---------------------------------------------------------------------------
def _multi_tensorcore_device():
    """True on chips where splitting the seq axis across TensorCores beats fusing
    the RNN head (v7x 2-TC per chip, v4/v5p megacore)."""
    try:
        kind = jax.devices()[0].device_kind.lower()
    except Exception:
        return False
    return any(tag in kind for tag in ("v7", "v4", "v5p"))


def _choose_seq_block(S, per_step_bytes, budget_bytes):
    """Largest TB (<=4) dividing S with >=4 grid steps (>=2 per TC on v7x) under
    the VMEM budget; fall back to >=2 grid steps, then 1."""
    divisors = [d for d in range(1, S + 1) if S % d == 0]
    for min_grid in (4, 2, 1):
        cands = [d for d in divisors
                 if S // d >= min_grid and d <= 4 and per_step_bytes(d) <= budget_bytes]
        if cands:
            return max(cands)
    return 1


def dyn_gnn_forward(kp, x_all, adjI, pool, batch_size, *,
                    seq_block=None, fuse_rnn_head=None,
                    vmem_limit_bytes=32 * 1024 * 1024):
    """kp: prepared (padded / packed / bf16) params.
    x_all: (S, N, Fp) bf16.  adjI: (N, N) bf16 adjacency WITH self loops folded.
    pool: (Bp, N) bf16 pooling matrix (batch rows padded to a multiple of 8)."""
    S, N, Fp = x_all.shape
    Bp = pool.shape[0]
    Hp = kp["w1_0"].shape[-1]
    Op = kp["glw"].shape[-1]
    Rp = kp["whh"].shape[0]
    L1 = kp["w1_k"].shape[1]

    if fuse_rnn_head is None:
        fuse_rnn_head = not _multi_tensorcore_device()

    def per_step_bytes(tb):
        per_t = (N * Fp * 2 + Fp * Hp * 2 + Hp * Hp * 2
                 + L1 * 2 * Hp * Hp * 2 + (1 + L1) * 4 * Hp * 4 + Bp * Op * 4)
        const = (N * N * 2 + Bp * N * 2 + Hp * Op * 2 + Op * 4
                 + 2 * Op * Rp + 2 * Rp * Rp)
        return 2 * (tb * per_t + const)        # 2x: default double buffering

    if seq_block is None:
        # v7x guard: stay well under its 64 MiB physical / 32 MiB scoped VMEM.
        seq_block = _choose_seq_block(S, per_step_bytes,
                                      min(vmem_limit_bytes, 24 * 1024 * 1024))
    assert S % seq_block == 0
    TB = seq_block

    # Advisory cost estimate.
    flops_t = (2 * N * N * Fp + 2 * N * Fp * Hp + 2 * N * Hp * Hp
               + L1 * (2 * N * N * Hp + 4 * N * Hp * Hp)
               + 2 * Bp * N * Hp + 2 * Bp * Hp * Op
               + 2 * Bp * Op * Rp + 2 * Bp * Rp * Rp)
    gnn_arrays = (x_all, adjI, kp["w1_0"], kp["vec0"], kp["w2_0"],
                  kp["w1_k"], kp["vec_k"], kp["w2_k"], pool, kp["glw"], kp["glb"])
    bytes_accessed = (sum(int(a.size) * a.dtype.itemsize for a in gnn_arrays)
                      + S * Bp * Op * 4)
    cost = pl.CostEstimate(flops=int(S * flops_t),
                           transcendentals=int(S * ((L1 + 1) * 2 * N * Hp + Bp * Rp)),
                           bytes_accessed=int(bytes_accessed))

    # Per-timestep operands are blocked along the seq axis; shared operands use a
    # constant index_map (single DMA for the whole grid).
    gin_in_specs = [
        pl.BlockSpec((TB, N, Fp), lambda t: (t, 0, 0)),            # x
        pl.BlockSpec((N, N), lambda t: (0, 0)),                    # adj + I (shared)
        pl.BlockSpec((TB, Fp, Hp), lambda t: (t, 0, 0)),           # w1 layer 0
        pl.BlockSpec((TB, 4, Hp), lambda t: (t, 0, 0)),            # packed [b1,g,beta,b2] layer 0
        pl.BlockSpec((TB, Hp, Hp), lambda t: (t, 0, 0)),           # w2 layer 0
        pl.BlockSpec((TB, L1, Hp, Hp), lambda t: (t, 0, 0, 0)),    # w1, layers 1..
        pl.BlockSpec((TB, L1, 4, Hp), lambda t: (t, 0, 0, 0)),     # packed vectors, layers 1..
        pl.BlockSpec((TB, L1, Hp, Hp), lambda t: (t, 0, 0, 0)),    # w2, layers 1..
        pl.BlockSpec((Bp, N), lambda t: (0, 0)),                   # pooling matrix (shared)
        pl.BlockSpec((Hp, Op), lambda t: (0, 0)),                  # linear_gnn W (shared)
        pl.BlockSpec((1, Op), lambda t: (0, 0)),                   # linear_gnn b (shared)
    ]
    gin_inputs = (x_all, adjI, kp["w1_0"], kp["vec0"], kp["w2_0"],
                  kp["w1_k"], kp["vec_k"], kp["w2_k"], pool, kp["glw"], kp["glb"])

    if fuse_rnn_head:
        rnn_specs = [
            pl.BlockSpec((Op, Rp), lambda t: (0, 0)),              # RNN W_ih (shared)
            pl.BlockSpec((Rp, Rp), lambda t: (0, 0)),              # RNN W_hh (shared)
            pl.BlockSpec((1, Rp), lambda t: (0, 0)),               # b_ih + b_hh (shared)
            pl.BlockSpec((Rp, 1), lambda t: (0, 0)),               # linear_rnn W (shared)
            pl.BlockSpec((1, 1), lambda t: (0, 0)),                # linear_rnn b (shared)
        ]
        out = pl.pallas_call(
            _gnn_rnn_fused_kernel,
            out_shape=jax.ShapeDtypeStruct((Bp, 1), jnp.float32),
            grid=(S // TB,),
            in_specs=gin_in_specs + rnn_specs,
            out_specs=pl.BlockSpec((Bp, 1), lambda t: (0, 0)),
            scratch_shapes=[pltpu.VMEM((Bp, Rp), jnp.float32)],
            compiler_params=pltpu.CompilerParams(
                dimension_semantics=("arbitrary",),   # carried RNN state -> sequential
                vmem_limit_bytes=vmem_limit_bytes),
            cost_estimate=cost,
        )(*gin_inputs, kp["wih"], kp["whh"], kp["brnn"], kp["lw"], kp["lb"])
        return out[:batch_size]

    h_all = pl.pallas_call(
        _gnn_block_kernel,
        out_shape=jax.ShapeDtypeStruct((S, Bp, Op), jnp.float32),
        grid=(S // TB,),
        in_specs=gin_in_specs,
        out_specs=pl.BlockSpec((TB, Bp, Op), lambda t: (t, 0, 0)),
        compiler_params=pltpu.CompilerParams(
            dimension_semantics=("parallel",),        # seq axis splits across TCs (v7x)
            vmem_limit_bytes=vmem_limit_bytes),
        cost_estimate=cost,
    )(*gin_inputs)

    out = pl.pallas_call(
        _rnn_head_kernel,
        out_shape=jax.ShapeDtypeStruct((Bp, 1), jnp.float32),
    )(h_all, kp["wih"], kp["whh"], kp["brnn"], kp["lw"], kp["lb"])
    return out[:batch_size]


# ---------------------------------------------------------------------------
# Parameter init (torch-like unpadded shapes) + kernel-side preparation
# ---------------------------------------------------------------------------
def init_params(key, seq_len, layers_gnn, input_gnn, hidden_gnn, output_gnn, hidden_rnn):
    assert layers_gnn >= 2, "this implementation assumes >= 2 GIN layers"
    L1 = layers_gnn - 1
    ks = jax.random.split(key, 16)

    def nrm(k, shape, scale=0.2):
        return (scale * jax.random.normal(k, shape)).astype(jnp.float32)

    return dict(
        w1_0=nrm(ks[0], (seq_len, input_gnn, hidden_gnn)),
        b1_0=nrm(ks[1], (seq_len, hidden_gnn)),
        g_0=jnp.ones((seq_len, hidden_gnn), jnp.float32),
        be_0=jnp.zeros((seq_len, hidden_gnn), jnp.float32),
        w2_0=nrm(ks[2], (seq_len, hidden_gnn, hidden_gnn)),
        b2_0=nrm(ks[3], (seq_len, hidden_gnn)),
        w1_k=nrm(ks[4], (seq_len, L1, hidden_gnn, hidden_gnn)),
        b1_k=nrm(ks[5], (seq_len, L1, hidden_gnn)),
        g_k=jnp.ones((seq_len, L1, hidden_gnn), jnp.float32),
        be_k=jnp.zeros((seq_len, L1, hidden_gnn), jnp.float32),
        w2_k=nrm(ks[6], (seq_len, L1, hidden_gnn, hidden_gnn)),
        b2_k=nrm(ks[7], (seq_len, L1, hidden_gnn)),
        glw=nrm(ks[8], (hidden_gnn, output_gnn)),
        glb=nrm(ks[9], (output_gnn,)),
        wih=nrm(ks[10], (output_gnn, hidden_rnn)),
        whh=nrm(ks[11], (hidden_rnn, hidden_rnn)),
        bih=nrm(ks[12], (hidden_rnn,)),
        bhh=nrm(ks[13], (hidden_rnn,)),
        lw=nrm(ks[14], (hidden_rnn, 1)),
        lb=nrm(ks[15], (1,)),
    )


def prepare_kernel_params(p):
    """Round F/H/R up to the bf16 sublane pack (16), pad ONLY the HBM-written
    lane dim (Op) to 128, cast matmul weights to bf16, pack the small
    per-timestep vectors, and pre-combine the RNN biases."""
    S, F, H = p["w1_0"].shape
    L1 = p["w1_k"].shape[1]
    O = p["glw"].shape[1]
    R = p["whh"].shape[0]
    Fp, Hp, Rp = _round_up(F, 16), _round_up(H, 16), _round_up(R, 16)
    Op = _round_up(O, LANE)
    bf16, f32 = jnp.bfloat16, jnp.float32

    def pack_vecs(*vs, shape):
        return _pad_to(jnp.stack(vs, axis=-2), shape).astype(f32)

    return dict(
        w1_0=_pad_to(p["w1_0"], (S, Fp, Hp)).astype(bf16),
        vec0=pack_vecs(p["b1_0"], p["g_0"], p["be_0"], p["b2_0"], shape=(S, 4, Hp)),
        w2_0=_pad_to(p["w2_0"], (S, Hp, Hp)).astype(bf16),
        w1_k=_pad_to(p["w1_k"], (S, L1, Hp, Hp)).astype(bf16),
        vec_k=pack_vecs(p["b1_k"], p["g_k"], p["be_k"], p["b2_k"], shape=(S, L1, 4, Hp)),
        w2_k=_pad_to(p["w2_k"], (S, L1, Hp, Hp)).astype(bf16),
        glw=_pad_to(p["glw"], (Hp, Op)).astype(bf16),
        glb=_pad_to(p["glb"][None, :], (1, Op)).astype(f32),
        wih=_pad_to(p["wih"], (Op, Rp)).astype(bf16),
        whh=_pad_to(p["whh"], (Rp, Rp)).astype(bf16),
        brnn=_pad_to((p["bih"] + p["bhh"])[None, :], (1, Rp)).astype(f32),
        lw=_pad_to(p["lw"], (Rp, 1)).astype(f32),
        lb=p["lb"][None, :].astype(f32),
    )


def prepare_inputs(x_all, adj, pool):
    """Fold the GIN self loop into the adjacency (exact in bf16), pad the batch
    rows of the pooling matrix to a multiple of 8, pad F to the bf16 sublane pack."""
    S, N, F = x_all.shape
    B = pool.shape[0]
    Fp = _round_up(F, 16)
    Bp = _round_up(B, 8)
    # BatchNorm stats run over the node axis -> do NOT zero-pad N.
    assert N % 8 == 0, "node count must be a multiple of 8 (sublane aligned)"
    x_p = _pad_to(x_all, (S, N, Fp)).astype(jnp.bfloat16)
    adjI = (adj + jnp.eye(N, dtype=adj.dtype)).astype(jnp.bfloat16)
    pool_p = _pad_to(pool, (Bp, N)).astype(jnp.bfloat16)
    return x_p, adjI, pool_p


def build_graph_data(key, seq_len, batch_size, nodes_per_graph, input_gnn):
    """Ring graphs per example; single shared adjacency across timesteps."""
    N = batch_size * nodes_per_graph
    A = np.zeros((N, N), np.float32)
    for g in range(batch_size):
        base = g * nodes_per_graph
        for i in range(nodes_per_graph):
            j = (i + 1) % nodes_per_graph
            A[base + i, base + j] = 1.0
            A[base + j, base + i] = 1.0
    pool = np.zeros((batch_size, N), np.float32)
    for g in range(batch_size):
        pool[g, g * nodes_per_graph:(g + 1) * nodes_per_graph] = 1.0
    x_all = (0.5 * jax.random.normal(key, (seq_len, N, input_gnn))).astype(jnp.float32)
    return x_all, jnp.asarray(A), jnp.asarray(pool)


# ---------------------------------------------------------------------------
# Pure-JAX reference (mirror of the PyTorch forward).
# matmul_dtype=f32                    -> the module's f32 semantics;
# matmul_dtype=bf16, fold_self_loop=1 -> exact numeric mirror of the kernel.
# ---------------------------------------------------------------------------
def reference_forward(params, x_all, adj, pool, *, matmul_dtype=jnp.float32,
                      fold_self_loop=False):
    S = x_all.shape[0]
    L1 = params["w1_k"].shape[1]
    f32 = jnp.float32
    c = lambda a: a.astype(matmul_dtype)
    adjI = adj + jnp.eye(adj.shape[0], dtype=adj.dtype)
    pool_q = c(pool)

    def mlp(z, w1, b1, g, be, w2, b2):
        z1 = jnp.dot(c(z), c(w1), preferred_element_type=f32) + b1
        m = jnp.mean(z1, axis=0, keepdims=True)
        zc = z1 - m
        v = jnp.mean(zc * zc, axis=0, keepdims=True)
        z1 = jnp.tanh(zc * (g * lax.rsqrt(v + BN_EPS)) + be)
        return jnp.tanh(jnp.dot(c(z1), c(w2), preferred_element_type=f32) + b2)

    def agg(x):
        if fold_self_loop:
            return jnp.dot(c(adjI), c(x), preferred_element_type=f32)
        return jnp.dot(c(adj), c(x), preferred_element_type=f32) + x.astype(f32)

    hs = []
    for t in range(S):
        x = agg(x_all[t])
        x = mlp(x, params["w1_0"][t], params["b1_0"][t], params["g_0"][t],
                params["be_0"][t], params["w2_0"][t], params["b2_0"][t])
        for l in range(L1):
            x = mlp(agg(x), params["w1_k"][t, l], params["b1_k"][t, l],
                    params["g_k"][t, l], params["be_k"][t, l],
                    params["w2_k"][t, l], params["b2_k"][t, l])
        pooled = jnp.dot(pool_q, c(x), preferred_element_type=f32)
        hs.append(jnp.dot(c(pooled), c(params["glw"]), preferred_element_type=f32)
                  + params["glb"])
    h_all = jnp.stack(hs)

    B, R = pool.shape[0], params["whh"].shape[0]
    h = jnp.zeros((B, R), f32)
    for t in range(S):
        h = jnp.tanh(jnp.dot(c(h_all[t]), c(params["wih"]), preferred_element_type=f32)
                     + params["bih"]
                     + jnp.dot(c(h), c(params["whh"]), preferred_element_type=f32)
                     + params["bhh"])
    logits = jnp.dot(h, params["lw"], preferred_element_type=f32) + params["lb"]
    return jax.nn.sigmoid(logits)


if __name__ == "__main__":
    # Small config consistent with DYN_GNN(input_gnn, hidden_gnn, output_gnn,
    #                                      layers_gnn, hidden_rnn, sequence_length)
    seq_len, layers_gnn = 8, 2
    input_gnn, hidden_gnn, output_gnn, hidden_rnn = 16, 32, 16, 32
    batch_size, nodes_per_graph = 4, 8          # N = 32 nodes total

    key = jax.random.PRNGKey(0)
    k_param, k_data = jax.random.split(key)
    params = init_params(k_param, seq_len, layers_gnn,
                         input_gnn, hidden_gnn, output_gnn, hidden_rnn)
    x_all, adj, pool = build_graph_data(k_data, seq_len, batch_size,
                                        nodes_per_graph, input_gnn)

    kp = prepare_kernel_params(params)
    x_p, adjI_p, pool_p = prepare_inputs(x_all, adj, pool)

    # Exercise both code paths (fused RNN head for 1-TC chips, split for
    # multi-TC chips) plus the auto-selected one.
    out_fused = jax.block_until_ready(
        dyn_gnn_forward(kp, x_p, adjI_p, pool_p, batch_size, fuse_rnn_head=True))
    out_split = jax.block_until_ready(
        dyn_gnn_forward(kp, x_p, adjI_p, pool_p, batch_size, fuse_rnn_head=False))
    out_auto = jax.block_until_ready(
        dyn_gnn_forward(kp, x_p, adjI_p, pool_p, batch_size))
    assert out_auto.shape == (batch_size, 1)

    # 1) exact-mirror check: same math, same bf16 casts, folded self loop.
    ref_bf16 = reference_forward(params, x_all, adj, pool,
                                 matmul_dtype=jnp.bfloat16, fold_self_loop=True)
    # 2) module-semantics check: pure f32 torch-style forward.
    ref_f32 = reference_forward(params, x_all, adj, pool, matmul_dtype=jnp.float32)

    for name, out in (("fused", out_fused), ("split", out_split), ("auto", out_auto)):
        err_mirror = float(jnp.max(jnp.abs(out - ref_bf16)))
        err_f32 = float(jnp.max(jnp.abs(out - ref_f32)))
        assert err_mirror < 5e-3, f"{name}: mismatch vs bf16-mirror reference: {err_mirror}"
        assert err_f32 < 5e-2, f"{name}: mismatch vs f32 reference: {err_f32}"

    print("KERNEL_OK")
</pallas_src>

<mosaic_0001>
module attributes {stable_mosaic.version = 11 : i64} {
  func.func @_gnn_rnn_fused_kernel(%arg0: i32, %arg1: memref<2x32x16xbf16, #tpu.memory_space<vmem>>, %arg2: memref<32x32xbf16, #tpu.memory_space<vmem>>, %arg3: memref<2x16x32xbf16, #tpu.memory_space<vmem>>, %arg4: memref<2x4x32xf32, #tpu.memory_space<vmem>>, %arg5: memref<2x32x32xbf16, #tpu.memory_space<vmem>>, %arg6: memref<2x1x32x32xbf16, #tpu.memory_space<vmem>>, %arg7: memref<2x1x4x32xf32, #tpu.memory_space<vmem>>, %arg8: memref<2x1x32x32xbf16, #tpu.memory_space<vmem>>, %arg9: memref<8x32xbf16, #tpu.memory_space<vmem>>, %arg10: memref<32x128xbf16, #tpu.memory_space<vmem>>, %arg11: memref<1x128xf32, #tpu.memory_space<vmem>>, %arg12: memref<128x32xbf16, #tpu.memory_space<vmem>>, %arg13: memref<32x32xbf16, #tpu.memory_space<vmem>>, %arg14: memref<1x32xf32, #tpu.memory_space<vmem>>, %arg15: memref<32x1xf32, #tpu.memory_space<vmem>>, %arg16: memref<1x1xf32, #tpu.memory_space<vmem>>, %arg17: memref<8x1xf32, #tpu.memory_space<vmem>>, %arg18: memref<8x32xf32, #tpu.memory_space<vmem>>) attributes {dimension_semantics = [#tpu.dimension_semantics<arbitrary>], iteration_bounds = array<i64: 4>, scalar_prefetch = 0 : i64, scratch_operands = 1 : i64, tpu.core_type = #tpu.core_type<tc>, window_params = [{transform_indices = @transform_0, window_bounds = array<i64: 2, 32, 16>}, {pipeline_mode = #tpu.pipeline_mode<synchronous>, transform_indices = @transform_1, window_bounds = array<i64: 32, 32>}, {transform_indices = @transform_2, window_bounds = array<i64: 2, 16, 32>}, {transform_indices = @transform_3, window_bounds = array<i64: 2, 4, 32>}, {transform_indices = @transform_4, window_bounds = array<i64: 2, 32, 32>}, {transform_indices = @transform_5, window_bounds = array<i64: 2, 1, 32, 32>}, {transform_indices = @transform_6, window_bounds = array<i64: 2, 1, 4, 32>}, {transform_indices = @transform_7, window_bounds = array<i64: 2, 1, 32, 32>}, {pipeline_mode = #tpu.pipeline_mode<synchronous>, transform_indices = @transform_8, window_bounds = array<i64: 8, 32>}, {pipeline_mode = #tpu.pipeline_mode<synchronous>, transform_indices = @transform_9, window_bounds = array<i64: 32, 128>}, {pipeline_mode = #tpu.pipeline_mode<synchronous>, transform_indices = @transform_10, window_bounds = array<i64: 1, 128>}, {pipeline_mode = #tpu.pipeline_mode<synchronous>, transform_indices = @transform_11, window_bounds = array<i64: 128, 32>}, {pipeline_mode = #tpu.pipeline_mode<synchronous>, transform_indices = @transform_12, window_bounds = array<i64: 32, 32>}, {pipeline_mode = #tpu.pipeline_mode<synchronous>, transform_indices = @transform_13, window_bounds = array<i64: 1, 32>}, {pipeline_mode = #tpu.pipeline_mode<synchronous>, transform_indices = @transform_14, window_bounds = array<i64: 32, 1>}, {pipeline_mode = #tpu.pipeline_mode<synchronous>, transform_indices = @transform_15, window_bounds = array<i64: 1, 1>}, {pipeline_mode = #tpu.pipeline_mode<synchronous>, transform_indices = @transform_16, window_bounds = array<i64: 8, 1>}]} {
    %c0_i32 = arith.constant 0 : i32
    %0 = arith.cmpi eq, %arg0, %c0_i32 : i32
    %1 = arith.extui %0 : i1 to i32
    %c0_i32_0 = arith.constant 0 : i32
    %2 = arith.cmpi ne, %1, %c0_i32_0 : i32
    scf.if %2 {
      %cst_102 = arith.constant 0.000000e+00 : f32
      %215 = vector.broadcast %cst_102 : f32 to vector<8x32xf32>
      %c0_103 = arith.constant 0 : index
      %c0_104 = arith.constant 0 : index
      %216 = vector.load %arg18[%c0_103, %c0_104] : memref<8x32xf32, #tpu.memory_space<vmem>>, vector<8x32xf32>
      tpu.vector_store %arg18[%c0_103, %c0_104], %215 {strides = array<i32>} : memref<8x32xf32, #tpu.memory_space<vmem>>, vector<8x32xf32>,
    } else {
    }
    %c0 = arith.constant 0 : index
    %c0_1 = arith.constant 0 : index
    %3 = vector.load %arg2[%c0, %c0_1] : memref<32x32xbf16, #tpu.memory_space<vmem>>, vector<32x32xbf16>
    %c0_2 = arith.constant 0 : index
    %c0_3 = arith.constant 0 : index
    %4 = vector.load %arg9[%c0_2, %c0_3] : memref<8x32xbf16, #tpu.memory_space<vmem>>, vector<8x32xbf16>
    %c0_4 = arith.constant 0 : index
    %c0_5 = arith.constant 0 : index
    %5 = vector.load %arg10[%c0_4, %c0_5] : memref<32x128xbf16, #tpu.memory_space<vmem>>, vector<32x128xbf16>
    %c0_6 = arith.constant 0 : index
    %c0_7 = arith.constant 0 : index
    %6 = vector.load %arg11[%c0_6, %c0_7] : memref<1x128xf32, #tpu.memory_space<vmem>>, vector<1x128xf32>
    %c0_8 = arith.constant 0 : index
    %c0_9 = arith.constant 0 : index
    %c0_10 = arith.constant 0 : index
    %7 = vector.load %arg1[%c0_8, %c0_9, %c0_10] : memref<2x32x16xbf16, #tpu.memory_space<vmem>>, vector<1x32x16xbf16>
    %8 = vector.shape_cast %7 : vector<1x32x16xbf16> to vector<32x16xbf16>
    %c1 = arith.constant 1 : index
    %c0_11 = arith.constant 0 : index
    %c0_12 = arith.constant 0 : index
    %9 = vector.load %arg1[%c1, %c0_11, %c0_12] : memref<2x32x16xbf16, #tpu.memory_space<vmem>>, vector<1x32x16xbf16>
    %10 = vector.shape_cast %9 : vector<1x32x16xbf16> to vector<32x16xbf16>
    %11 = tpu.concatenate %8, %10 in 1 : vector<32x16xbf16>, vector<32x16xbf16> -> vector<32x32xbf16>
    %cst = arith.constant dense<0.000000e+00> : vector<32x32xf32>
    %12 = tpu.matmul %3, %11, %cst {dimension_numbers = #tpu.dot_dimension_numbers<[1], [0], [0], [1], [0, 0, 1, 1], [], []>} : vector<32x32xbf16>, vector<32x32xbf16>, vector<32x32xf32> -> vector<32x32xf32>
    %13 = vector.extract_strided_slice %12 {offsets = [0, 0], sizes = [32, 16], strides = [1, 1]} : vector<32x32xf32> to vector<32x16xf32>
    %c0_13 = arith.constant 0 : index
    %c0_14 = arith.constant 0 : index
    %c0_15 = arith.constant 0 : index
    %14 = vector.load %arg3[%c0_13, %c0_14, %c0_15] : memref<2x16x32xbf16, #tpu.memory_space<vmem>>, vector<1x16x32xbf16>
    %15 = vector.shape_cast %14 : vector<1x16x32xbf16> to vector<16x32xbf16>
    %c0_16 = arith.constant 0 : index
    %c0_17 = arith.constant 0 : index
    %c0_18 = arith.constant 0 : index
    %16 = vector.load %arg4[%c0_16, %c0_17, %c0_18] : memref<2x4x32xf32, #tpu.memory_space<vmem>>, vector<1x4x32xf32>
    %17 = vector.shape_cast %16 : vector<1x4x32xf32> to vector<4x32xf32>
    %c0_19 = arith.constant 0 : index
    %c0_20 = arith.constant 0 : index
    %c0_21 = arith.constant 0 : index
    %18 = vector.load %arg5[%c0_19, %c0_20, %c0_21] : memref<2x32x32xbf16, #tpu.memory_space<vmem>>, vector<1x32x32xbf16>
    %19 = vector.shape_cast %18 : vector<1x32x32xbf16> to vector<32x32xbf16>
    %20 = vector.extract_strided_slice %17 {offsets = [0, 0], sizes = [1, 32], strides = [1, 1]} : vector<4x32xf32> to vector<1x32xf32>
    %21 = vector.extract_strided_slice %17 {offsets = [1, 0], sizes = [1, 32], strides = [1, 1]} : vector<4x32xf32> to vector<1x32xf32>
    %22 = vector.extract_strided_slice %17 {offsets = [2, 0], sizes = [1, 32], strides = [1, 1]} : vector<4x32xf32> to vector<1x32xf32>
    %23 = vector.extract_strided_slice %17 {offsets = [3, 0], sizes = [1, 32], strides = [1, 1]} : vector<4x32xf32> to vector<1x32xf32>
    %24 = arith.truncf %13 : vector<32x16xf32> to vector<32x16xbf16>
    %cst_22 = arith.constant dense<0.000000e+00> : vector<32x32xf32>
    %25 = tpu.matmul %24, %15, %cst_22 {dimension_numbers = #tpu.dot_dimension_numbers<[1], [0], [0], [1], [0, 0, 1, 1], [], []>} : vector<32x16xbf16>, vector<16x32xbf16>, vector<32x32xf32> -> vector<32x32xf32>
    %26 = vector.broadcast %20 : vector<1x32xf32> to vector<32x32xf32>
    %27 = arith.addf %25, %26 : vector<32x32xf32>
    %cst_23 = arith.constant dense<0.000000e+00> : vector<32xf32>
    %28 = vector.multi_reduction <add>, %27, %cst_23 [0] : vector<32x32xf32> to vector<32xf32>
    %29 = vector.shape_cast %28 : vector<32xf32> to vector<1x32xf32>
    %cst_24 = arith.constant 3.200000e+01 : f32
    %30 = vector.broadcast %cst_24 : f32 to vector<1x32xf32>
    %31 = arith.divf %29, %30 : vector<1x32xf32>
    %32 = vector.broadcast %31 : vector<1x32xf32> to vector<32x32xf32>
    %33 = arith.subf %27, %32 : vector<32x32xf32>
    %34 = arith.mulf %33, %33 : vector<32x32xf32>
    %cst_25 = arith.constant dense<0.000000e+00> : vector<32xf32>
    %35 = vector.multi_reduction <add>, %34, %cst_25 [0] : vector<32x32xf32> to vector<32xf32>
    %36 = vector.shape_cast %35 : vector<32xf32> to vector<1x32xf32>
    %cst_26 = arith.constant 3.200000e+01 : f32
    %37 = vector.broadcast %cst_26 : f32 to vector<1x32xf32>
    %38 = arith.divf %36, %37 : vector<1x32xf32>
    %cst_27 = arith.constant 9.99999974E-6 : f32
    %39 = vector.broadcast %cst_27 : f32 to vector<1x32xf32>
    %40 = arith.addf %38, %39 : vector<1x32xf32>
    %41 = math.rsqrt %40 : vector<1x32xf32>
    %42 = arith.mulf %21, %41 : vector<1x32xf32>
    %43 = vector.broadcast %42 : vector<1x32xf32> to vector<32x32xf32>
    %44 = arith.mulf %33, %43 : vector<32x32xf32>
    %45 = vector.broadcast %22 : vector<1x32xf32> to vector<32x32xf32>
    %46 = arith.addf %44, %45 : vector<32x32xf32>
    %47 = math.tanh %46 : vector<32x32xf32>
    %48 = arith.truncf %47 : vector<32x32xf32> to vector<32x32xbf16>
    %cst_28 = arith.constant dense<0.000000e+00> : vector<32x32xf32>
    %49 = tpu.matmul %48, %19, %cst_28 {dimension_numbers = #tpu.dot_dimension_numbers<[1], [0], [0], [1], [0, 0, 1, 1], [], []>} : vector<32x32xbf16>, vector<32x32xbf16>, vector<32x32xf32> -> vector<32x32xf32>
    %50 = vector.broadcast %23 : vector<1x32xf32> to vector<32x32xf32>
    %51 = arith.addf %49, %50 : vector<32x32xf32>
    %52 = math.tanh %51 : vector<32x32xf32>
    %53 = vector.extract_strided_slice %12 {offsets = [0, 16], sizes = [32, 16], strides = [1, 1]} : vector<32x32xf32> to vector<32x16xf32>
    %c1_29 = arith.constant 1 : index
    %c0_30 = arith.constant 0 : index
    %c0_31 = arith.constant 0 : index
    %54 = vector.load %arg3[%c1_29, %c0_30, %c0_31] : memref<2x16x32xbf16, #tpu.memory_space<vmem>>, vector<1x16x32xbf16>
    %55 = vector.shape_cast %54 : vector<1x16x32xbf16> to vector<16x32xbf16>
    %c1_32 = arith.constant 1 : index
    %c0_33 = arith.constant 0 : index
    %c0_34 = arith.constant 0 : index
    %56 = vector.load %arg4[%c1_32, %c0_33, %c0_34] : memref<2x4x32xf32, #tpu.memory_space<vmem>>, vector<1x4x32xf32>
    %57 = vector.shape_cast %56 : vector<1x4x32xf32> to vector<4x32xf32>
    %c1_35 = arith.constant 1 : index
    %c0_36 = arith.constant 0 : index
    %c0_37 = arith.constant 0 : index
    %58 = vector.load %arg5[%c1_35, %c0_36, %c0_37] : memref<2x32x32xbf16, #tpu.memory_space<vmem>>, vector<1x32x32xbf16>
    %59 = vector.shape_cast %58 : vector<1x32x32xbf16> to vector<32x32xbf16>
    %60 = vector.extract_strided_slice %57 {offsets = [0, 0], sizes = [1, 32], strides = [1, 1]} : vector<4x32xf32> to vector<1x32xf32>
    %61 = vector.extract_strided_slice %57 {offsets = [1, 0], sizes = [1, 32], strides = [1, 1]} : vector<4x32xf32> to vector<1x32xf32>
    %62 = vector.extract_strided_slice %57 {offsets = [2, 0], sizes = [1, 32], strides = [1, 1]} : vector<4x32xf32> to vector<1x32xf32>
    %63 = vector.extract_strided_slice %57 {offsets = [3, 0], sizes = [1, 32], strides = [1, 1]} : vector<4x32xf32> to vector<1x32xf32>
    %64 = arith.truncf %53 : vector<32x16xf32> to vector<32x16xbf16>
    %cst_38 = arith.constant dense<0.000000e+00> : vector<32x32xf32>
    %65 = tpu.matmul %64, %55, %cst_38 {dimension_numbers = #tpu.dot_dimension_numbers<[1], [0], [0], [1], [0, 0, 1, 1], [], []>} : vector<32x16xbf16>, vector<16x32xbf16>, vector<32x32xf32> -> vector<32x32xf32>
    %66 = vector.broadcast %60 : vector<1x32xf32> to vector<32x32xf32>
    %67 = arith.addf %65, %66 : vector<32x32xf32>
    %cst_39 = arith.constant dense<0.000000e+00> : vector<32xf32>
    %68 = vector.multi_reduction <add>, %67, %cst_39 [0] : vector<32x32xf32> to vector<32xf32>
    %69 = vector.shape_cast %68 : vector<32xf32> to vector<1x32xf32>
    %cst_40 = arith.constant 3.200000e+01 : f32
    %70 = vector.broadcast %cst_40 : f32 to vector<1x32xf32>
    %71 = arith.divf %69, %70 : vector<1x32xf32>
    %72 = vector.broadcast %71 : vector<1x32xf32> to vector<32x32xf32>
    %73 = arith.subf %67, %72 : vector<32x32xf32>
    %74 = arith.mulf %73, %73 : vector<32x32xf32>
    %cst_41 = arith.constant dense<0.000000e+00> : vector<32xf32>
    %75 = vector.multi_reduction <add>, %74, %cst_41 [0] : vector<32x32xf32> to vector<32xf32>
    %76 = vector.shape_cast %75 : vector<32xf32> to vector<1x32xf32>
    %cst_42 = arith.constant 3.200000e+01 : f32
    %77 = vector.broadcast %cst_42 : f32 to vector<1x32xf32>
    %78 = arith.divf %76, %77 : vector<1x32xf32>
    %cst_43 = arith.constant 9.99999974E-6 : f32
    %79 = vector.broadcast %cst_43 : f32 to vector<1x32xf32>
    %80 = arith.addf %78, %79 : vector<1x32xf32>
    %81 = math.rsqrt %80 : vector<1x32xf32>
    %82 = arith.mulf %61, %81 : vector<1x32xf32>
    %83 = vector.broadcast %82 : vector<1x32xf32> to vector<32x32xf32>
    %84 = arith.mulf %73, %83 : vector<32x32xf32>
    %85 = vector.broadcast %62 : vector<1x32xf32> to vector<32x32xf32>
    %86 = arith.addf %84, %85 : vector<32x32xf32>
    %87 = math.tanh %86 : vector<32x32xf32>
    %88 = arith.truncf %87 : vector<32x32xf32> to vector<32x32xbf16>
    %cst_44 = arith.constant dense<0.000000e+00> : vector<32x32xf32>
    %89 = tpu.matmul %88, %59, %cst_44 {dimension_numbers = #tpu.dot_dimension_numbers<[1], [0], [0], [1], [0, 0, 1, 1], [], []>} : vector<32x32xbf16>, vector<32x32xbf16>, vector<32x32xf32> -> vector<32x32xf32>
    %90 = vector.broadcast %63 : vector<1x32xf32> to vector<32x32xf32>
    %91 = arith.addf %89, %90 : vector<32x32xf32>
    %92 = math.tanh %91 : vector<32x32xf32>
    %93 = arith.truncf %52 : vector<32x32xf32> to vector<32x32xbf16>
    %94 = arith.truncf %92 : vector<32x32xf32> to vector<32x32xbf16>
    %95 = tpu.concatenate %93, %94 in 1 : vector<32x32xbf16>, vector<32x32xbf16> -> vector<32x64xbf16>
    %cst_45 = arith.constant dense<0.000000e+00> : vector<32x64xf32>
    %96 = tpu.matmul %3, %95, %cst_45 {dimension_numbers = #tpu.dot_dimension_numbers<[1], [0], [0], [1], [0, 0, 1, 1], [], []>} : vector<32x32xbf16>, vector<32x64xbf16>, vector<32x64xf32> -> vector<32x64xf32>
    %97 = vector.extract_strided_slice %96 {offsets = [0, 0], sizes = [32, 32], strides = [1, 1]} : vector<32x64xf32> to vector<32x32xf32>
    %c0_46 = arith.constant 0 : index
    %c0_47 = arith.constant 0 : index
    %c0_48 = arith.constant 0 : index
    %c0_49 = arith.constant 0 : index
    %98 = vector.load %arg6[%c0_46, %c0_47, %c0_48, %c0_49] : memref<2x1x32x32xbf16, #tpu.memory_space<vmem>>, vector<1x1x32x32xbf16>
    %99 = vector.shape_cast %98 : vector<1x1x32x32xbf16> to vector<32x32xbf16>
    %c0_50 = arith.constant 0 : index
    %c0_51 = arith.constant 0 : index
    %c0_52 = arith.constant 0 : index
    %c0_53 = arith.constant 0 : index
    %100 = vector.load %arg7[%c0_50, %c0_51, %c0_52, %c0_53] : memref<2x1x4x32xf32, #tpu.memory_space<vmem>>, vector<1x1x4x32xf32>
    %101 = vector.shape_cast %100 : vector<1x1x4x32xf32> to vector<4x32xf32>
    %c0_54 = arith.constant 0 : index
    %c0_55 = arith.constant 0 : index
    %c0_56 = arith.constant 0 : index
    %c0_57 = arith.constant 0 : index
    %102 = vector.load %arg8[%c0_54, %c0_55, %c0_56, %c0_57] : memref<2x1x32x32xbf16, #tpu.memory_space<vmem>>, vector<1x1x32x32xbf16>
    %103 = vector.shape_cast %102 : vector<1x1x32x32xbf16> to vector<32x32xbf16>
    %104 = vector.extract_strided_slice %101 {offsets = [0, 0], sizes = [1, 32], strides = [1, 1]} : vector<4x32xf32> to vector<1x32xf32>
    %105 = vector.extract_strided_slice %101 {offsets = [1, 0], sizes = [1, 32], strides = [1, 1]} : vector<4x32xf32> to vector<1x32xf32>
    %106 = vector.extract_strided_slice %101 {offsets = [2, 0], sizes = [1, 32], strides = [1, 1]} : vector<4x32xf32> to vector<1x32xf32>
    %107 = vector.extract_strided_slice %101 {offsets = [3, 0], sizes = [1, 32], strides = [1, 1]} : vector<4x32xf32> to vector<1x32xf32>
    %108 = arith.truncf %97 : vector<32x32xf32> to vector<32x32xbf16>
    %cst_58 = arith.constant dense<0.000000e+00> : vector<32x32xf32>
    %109 = tpu.matmul %108, %99, %cst_58 {dimension_numbers = #tpu.dot_dimension_numbers<[1], [0], [0], [1], [0, 0, 1, 1], [], []>} : vector<32x32xbf16>, vector<32x32xbf16>, vector<32x32xf32> -> vector<32x32xf32>
    %110 = vector.broadcast %104 : vector<1x32xf32> to vector<32x32xf32>
    %111 = arith.addf %109, %110 : vector<32x32xf32>
    %cst_59 = arith.constant dense<0.000000e+00> : vector<32xf32>
    %112 = vector.multi_reduction <add>, %111, %cst_59 [0] : vector<32x32xf32> to vector<32xf32>
    %113 = vector.shape_cast %112 : vector<32xf32> to vector<1x32xf32>
    %cst_60 = arith.constant 3.200000e+01 : f32
    %114 = vector.broadcast %cst_60 : f32 to vector<1x32xf32>
    %115 = arith.divf %113, %114 : vector<1x32xf32>
    %116 = vector.broadcast %115 : vector<1x32xf32> to vector<32x32xf32>
    %117 = arith.subf %111, %116 : vector<32x32xf32>
    %118 = arith.mulf %117, %117 : vector<32x32xf32>
    %cst_61 = arith.constant dense<0.000000e+00> : vector<32xf32>
    %119 = vector.multi_reduction <add>, %118, %cst_61 [0] : vector<32x32xf32> to vector<32xf32>
    %120 = vector.shape_cast %119 : vector<32xf32> to vector<1x32xf32>
    %cst_62 = arith.constant 3.200000e+01 : f32
    %121 = vector.broadcast %cst_62 : f32 to vector<1x32xf32>
    %122 = arith.divf %120, %121 : vector<1x32xf32>
    %cst_63 = arith.constant 9.99999974E-6 : f32
    %123 = vector.broadcast %cst_63 : f32 to vector<1x32xf32>
    %124 = arith.addf %122, %123 : vector<1x32xf32>
    %125 = math.rsqrt %124 : vector<1x32xf32>
    %126 = arith.mulf %105, %125 : vector<1x32xf32>
    %127 = vector.broadcast %126 : vector<1x32xf32> to vector<32x32xf32>
    %128 = arith.mulf %117, %127 : vector<32x32xf32>
    %129 = vector.broadcast %106 : vector<1x32xf32> to vector<32x32xf32>
    %130 = arith.addf %128, %129 : vector<32x32xf32>
    %131 = math.tanh %130 : vector<32x32xf32>
    %132 = arith.truncf %131 : vector<32x32xf32> to vector<32x32xbf16>
    %cst_64 = arith.constant dense<0.000000e+00> : vector<32x32xf32>
    %133 = tpu.matmul %132, %103, %cst_64 {dimension_numbers = #tpu.dot_dimension_numbers<[1], [0], [0], [1], [0, 0, 1, 1], [], []>} : vector<32x32xbf16>, vector<32x32xbf16>, vector<32x32xf32> -> vector<32x32xf32>
    %134 = vector.broadcast %107 : vector<1x32xf32> to vector<32x32xf32>
    %135 = arith.addf %133, %134 : vector<32x32xf32>
    %136 = math.tanh %135 : vector<32x32xf32>
    %137 = vector.extract_strided_slice %96 {offsets = [0, 32], sizes = [32, 32], strides = [1, 1]} : vector<32x64xf32> to vector<32x32xf32>
    %c1_65 = arith.constant 1 : index
    %c0_66 = arith.constant 0 : index
    %c0_67 = arith.constant 0 : index
    %c0_68 = arith.constant 0 : index
    %138 = vector.load %arg6[%c1_65, %c0_66, %c0_67, %c0_68] : memref<2x1x32x32xbf16, #tpu.memory_space<vmem>>, vector<1x1x32x32xbf16>
    %139 = vector.shape_cast %138 : vector<1x1x32x32xbf16> to vector<32x32xbf16>
    %c1_69 = arith.constant 1 : index
    %c0_70 = arith.constant 0 : index
    %c0_71 = arith.constant 0 : index
    %c0_72 = arith.constant 0 : index
    %140 = vector.load %arg7[%c1_69, %c0_70, %c0_71, %c0_72] : memref<2x1x4x32xf32, #tpu.memory_space<vmem>>, vector<1x1x4x32xf32>
    %141 = vector.shape_cast %140 : vector<1x1x4x32xf32> to vector<4x32xf32>
    %c1_73 = arith.constant 1 : index
    %c0_74 = arith.constant 0 : index
    %c0_75 = arith.constant 0 : index
    %c0_76 = arith.constant 0 : index
    %142 = vector.load %arg8[%c1_73, %c0_74, %c0_75, %c0_76] : memref<2x1x32x32xbf16, #tpu.memory_space<vmem>>, vector<1x1x32x32xbf16>
    %143 = vector.shape_cast %142 : vector<1x1x32x32xbf16> to vector<32x32xbf16>
    %144 = vector.extract_strided_slice %141 {offsets = [0, 0], sizes = [1, 32], strides = [1, 1]} : vector<4x32xf32> to vector<1x32xf32>
    %145 = vector.extract_strided_slice %141 {offsets = [1, 0], sizes = [1, 32], strides = [1, 1]} : vector<4x32xf32> to vector<1x32xf32>
    %146 = vector.extract_strided_slice %141 {offsets = [2, 0], sizes = [1, 32], strides = [1, 1]} : vector<4x32xf32> to vector<1x32xf32>
    %147 = vector.extract_strided_slice %141 {offsets = [3, 0], sizes = [1, 32], strides = [1, 1]} : vector<4x32xf32> to vector<1x32xf32>
    %148 = arith.truncf %137 : vector<32x32xf32> to vector<32x32xbf16>
    %cst_77 = arith.constant dense<0.000000e+00> : vector<32x32xf32>
    %149 = tpu.matmul %148, %139, %cst_77 {dimension_numbers = #tpu.dot_dimension_numbers<[1], [0], [0], [1], [0, 0, 1, 1], [], []>} : vector<32x32xbf16>, vector<32x32xbf16>, vector<32x32xf32> -> vector<32x32xf32>
    %150 = vector.broadcast %144 : vector<1x32xf32> to vector<32x32xf32>
    %151 = arith.addf %149, %150 : vector<32x32xf32>
    %cst_78 = arith.constant dense<0.000000e+00> : vector<32xf32>
    %152 = vector.multi_reduction <add>, %151, %cst_78 [0] : vector<32x32xf32> to vector<32xf32>
    %153 = vector.shape_cast %152 : vector<32xf32> to vector<1x32xf32>
    %cst_79 = arith.constant 3.200000e+01 : f32
    %154 = vector.broadcast %cst_79 : f32 to vector<1x32xf32>
    %155 = arith.divf %153, %154 : vector<1x32xf32>
    %156 = vector.broadcast %155 : vector<1x32xf32> to vector<32x32xf32>
    %157 = arith.subf %151, %156 : vector<32x32xf32>
    %158 = arith.mulf %157, %157 : vector<32x32xf32>
    %cst_80 = arith.constant dense<0.000000e+00> : vector<32xf32>
    %159 = vector.multi_reduction <add>, %158, %cst_80 [0] : vector<32x32xf32> to vector<32xf32>
    %160 = vector.shape_cast %159 : vector<32xf32> to vector<1x32xf32>
    %cst_81 = arith.constant 3.200000e+01 : f32
    %161 = vector.broadcast %cst_81 : f32 to vector<1x32xf32>
    %162 = arith.divf %160, %161 : vector<1x32xf32>
    %cst_82 = arith.constant 9.99999974E-6 : f32
    %163 = vector.broadcast %cst_82 : f32 to vector<1x32xf32>
    %164 = arith.addf %162, %163 : vector<1x32xf32>
    %165 = math.rsqrt %164 : vector<1x32xf32>
    %166 = arith.mulf %145, %165 : vector<1x32xf32>
    %167 = vector.broadcast %166 : vector<1x32xf32> to vector<32x32xf32>
    %168 = arith.mulf %157, %167 : vector<32x32xf32>
    %169 = vector.broadcast %146 : vector<1x32xf32> to vector<32x32xf32>
    %170 = arith.addf %168, %169 : vector<32x32xf32>
    %171 = math.tanh %170 : vector<32x32xf32>
    %172 = arith.truncf %171 : vector<32x32xf32> to vector<32x32xbf16>
    %cst_83 = arith.constant dense<0.000000e+00> : vector<32x32xf32>
    %173 = tpu.matmul %172, %143, %cst_83 {dimension_numbers = #tpu.dot_dimension_numbers<[1], [0], [0], [1], [0, 0, 1, 1], [], []>} : vector<32x32xbf16>, vector<32x32xbf16>, vector<32x32xf32> -> vector<32x32xf32>
    %174 = vector.broadcast %147 : vector<1x32xf32> to vector<32x32xf32>
    %175 = arith.addf %173, %174 : vector<32x32xf32>
    %176 = math.tanh %175 : vector<32x32xf32>
    %177 = arith.truncf %136 : vector<32x32xf32> to vector<32x32xbf16>
    %178 = arith.truncf %176 : vector<32x32xf32> to vector<32x32xbf16>
    %179 = tpu.concatenate %177, %178 in 1 : vector<32x32xbf16>, vector<32x32xbf16> -> vector<32x64xbf16>
    %cst_84 = arith.constant dense<0.000000e+00> : vector<8x64xf32>
    %180 = tpu.matmul %4, %179, %cst_84 {dimension_numbers = #tpu.dot_dimension_numbers<[1], [0], [0], [1], [0, 0, 1, 1], [], []>} : vector<8x32xbf16>, vector<32x64xbf16>, vector<8x64xf32> -> vector<8x64xf32>
    %181 = vector.extract_strided_slice %180 {offsets = [0, 0], sizes = [8, 32], strides = [1, 1]} : vector<8x64xf32> to vector<8x32xf32>
    %182 = arith.truncf %181 : vector<8x32xf32> to vector<8x32xbf16>
    %cst_85 = arith.constant dense<0.000000e+00> : vector<8x128xf32>
    %183 = tpu.matmul %182, %5, %cst_85 {dimension_numbers = #tpu.dot_dimension_numbers<[1], [0], [0], [1], [0, 0, 1, 1], [], []>} : vector<8x32xbf16>, vector<32x128xbf16>, vector<8x128xf32> -> vector<8x128xf32>
    %184 = vector.broadcast %6 : vector<1x128xf32> to vector<8x128xf32>
    %185 = arith.addf %183, %184 : vector<8x128xf32>
    %186 = vector.extract_strided_slice %180 {offsets = [0, 32], sizes = [8, 32], strides = [1, 1]} : vector<8x64xf32> to vector<8x32xf32>
    %187 = arith.truncf %186 : vector<8x32xf32> to vector<8x32xbf16>
    %cst_86 = arith.constant dense<0.000000e+00> : vector<8x128xf32>
    %188 = tpu.matmul %187, %5, %cst_86 {dimension_numbers = #tpu.dot_dimension_numbers<[1], [0], [0], [1], [0, 0, 1, 1], [], []>} : vector<8x32xbf16>, vector<32x128xbf16>, vector<8x128xf32> -> vector<8x128xf32>
    %189 = vector.broadcast %6 : vector<1x128xf32> to vector<8x128xf32>
    %190 = arith.addf %188, %189 : vector<8x128xf32>
    %c0_87 = arith.constant 0 : index
    %c0_88 = arith.constant 0 : index
    %191 = vector.load %arg12[%c0_87, %c0_88] : memref<128x32xbf16, #tpu.memory_space<vmem>>, vector<128x32xbf16>
    %c0_89 = arith.constant 0 : index
    %c0_90 = arith.constant 0 : index
    %192 = vector.load %arg13[%c0_89, %c0_90] : memref<32x32xbf16, #tpu.memory_space<vmem>>, vector<32x32xbf16>
    %c0_91 = arith.constant 0 : index
    %c0_92 = arith.constant 0 : index
    %193 = vector.load %arg14[%c0_91, %c0_92] : memref<1x32xf32, #tpu.memory_space<vmem>>, vector<1x32xf32>
    %c0_93 = arith.constant 0 : index
    %c0_94 = arith.constant 0 : index
    %194 = vector.load %arg18[%c0_93, %c0_94] : memref<8x32xf32, #tpu.memory_space<vmem>>, vector<8x32xf32>
    %195 = arith.truncf %185 : vector<8x128xf32> to vector<8x128xbf16>
    %cst_95 = arith.constant dense<0.000000e+00> : vector<8x32xf32>
    %196 = tpu.matmul %195, %191, %cst_95 {dimension_numbers = #tpu.dot_dimension_numbers<[1], [0], [0], [1], [0, 0, 1, 1], [], []>} : vector<8x128xbf16>, vector<128x32xbf16>, vector<8x32xf32> -> vector<8x32xf32>
    %197 = arith.truncf %194 : vector<8x32xf32> to vector<8x32xbf16>
    %cst_96 = arith.constant dense<0.000000e+00> : vector<8x32xf32>
    %198 = tpu.matmul %197, %192, %cst_96 {dimension_numbers = #tpu.dot_dimension_numbers<[1], [0], [0], [1], [0, 0, 1, 1], [], []>} : vector<8x32xbf16>, vector<32x32xbf16>, vector<8x32xf32> -> vector<8x32xf32>
    %199 = arith.addf %196, %198 : vector<8x32xf32>
    %200 = vector.broadcast %193 : vector<1x32xf32> to vector<8x32xf32>
    %201 = arith.addf %199, %200 : vector<8x32xf32>
    %202 = math.tanh %201 : vector<8x32xf32>
    %203 = arith.truncf %190 : vector<8x128xf32> to vector<8x128xbf16>
    %cst_97 = arith.constant dense<0.000000e+00> : vector<8x32xf32>
    %204 = tpu.matmul %203, %191, %cst_97 {dimension_numbers = #tpu.dot_dimension_numbers<[1], [0], [0], [1], [0, 0, 1, 1], [], []>} : vector<8x128xbf16>, vector<128x32xbf16>, vector<8x32xf32> -> vector<8x32xf32>
    %205 = arith.truncf %202 : vector<8x32xf32> to vector<8x32xbf16>
    %cst_98 = arith.constant dense<0.000000e+00> : vector<8x32xf32>
    %206 = tpu.matmul %205, %192, %cst_98 {dimension_numbers = #tpu.dot_dimension_numbers<[1], [0], [0], [1], [0, 0, 1, 1], [], []>} : vector<8x32xbf16>, vector<32x32xbf16>, vector<8x32xf32> -> vector<8x32xf32>
    %207 = arith.addf %204, %206 : vector<8x32xf32>
    %208 = vector.broadcast %193 : vector<1x32xf32> to vector<8x32xf32>
    %209 = arith.addf %207, %208 : vector<8x32xf32>
    %210 = math.tanh %209 : vector<8x32xf32>
    %c0_99 = arith.constant 0 : index
    %c0_100 = arith.constant 0 : index
    %211 = vector.load %arg18[%c0_99, %c0_100] : memref<8x32xf32, #tpu.memory_space<vmem>>, vector<8x32xf32>
    tpu.vector_store %arg18[%c0_99, %c0_100], %210 {strides = array<i32>} : memref<8x32xf32, #tpu.memory_space<vmem>>, vector<8x32xf32>,
    %c3_i32 = arith.constant 3 : i32
    %212 = arith.cmpi eq, %arg0, %c3_i32 : i32
    %213 = arith.extui %212 : i1 to i32
    %c0_i32_101 = arith.constant 0 : i32
    %214 = arith.cmpi ne, %213, %c0_i32_101 : i32
    scf.if %214 {
      %c0_102 = arith.constant 0 : index
      %c0_103 = arith.constant 0 : index
      %215 = vector.load %arg15[%c0_102, %c0_103] : memref<32x1xf32, #tpu.memory_space<vmem>>, vector<32x1xf32>
      %cst_104 = arith.constant dense<0.000000e+00> : vector<8x1xf32>
      %216 = tpu.matmul %210, %215, %cst_104 {dimension_numbers = #tpu.dot_dimension_numbers<[1], [0], [0], [1], [0, 0, 1, 1], [], []>} : vector<8x32xf32>, vector<32x1xf32>, vector<8x1xf32> -> vector<8x1xf32>
      %c0_105 = arith.constant 0 : index
      %c0_106 = arith.constant 0 : index
      %217 = vector.load %arg16[%c0_105, %c0_106] : memref<1x1xf32, #tpu.memory_space<vmem>>, vector<1x1xf32>
      %218 = vector.broadcast %217 : vector<1x1xf32> to vector<8x1xf32>
      %219 = arith.addf %216, %218 : vector<8x1xf32>
      %220 = arith.negf %219 : vector<8x1xf32>
      %221 = math.exp %220 : vector<8x1xf32>
      %cst_107 = arith.constant 1.000000e+00 : f32
      %222 = vector.broadcast %cst_107 : f32 to vector<8x1xf32>
      %223 = arith.addf %222, %221 : vector<8x1xf32>
      %224 = arith.divf %222, %223 : vector<8x1xf32>
      %c0_108 = arith.constant 0 : index
      %c0_109 = arith.constant 0 : index
      %225 = vector.load %arg17[%c0_108, %c0_109] : memref<8x1xf32, #tpu.memory_space<vmem>>, vector<8x1xf32>
      tpu.vector_store %arg17[%c0_108, %c0_109], %224 {strides = array<i32>} : memref<8x1xf32, #tpu.memory_space<vmem>>, vector<8x1xf32>,
    } else {
    }
    return
  }
  func.func @transform_0(%arg0: i32) -> (i32, i32, i32) {
    %c0_i32 = arith.constant 0 : i32
    %c0_i32_0 = arith.constant 0 : i32
    %c0_i32_1 = arith.constant 0 : i32
    return %arg0, %c0_i32, %c0_i32_0 : i32, i32, i32
  }
  func.func @transform_1(%arg0: i32) -> (i32, i32) {
    %c0_i32 = arith.constant 0 : i32
    %c0_i32_0 = arith.constant 0 : i32
    %c0_i32_1 = arith.constant 0 : i32
    return %c0_i32, %c0_i32_0 : i32, i32
  }
  func.func @transform_2(%arg0: i32) -> (i32, i32, i32) {
    %c0_i32 = arith.constant 0 : i32
    %c0_i32_0 = arith.constant 0 : i32
    %c0_i32_1 = arith.constant 0 : i32
    return %arg0, %c0_i32, %c0_i32_0 : i32, i32, i32
  }
  func.func @transform_3(%arg0: i32) -> (i32, i32, i32) {
    %c0_i32 = arith.constant 0 : i32
    %c0_i32_0 = arith.constant 0 : i32
    %c0_i32_1 = arith.constant 0 : i32
    return %arg0, %c0_i32, %c0_i32_0 : i32, i32, i32
  }
  func.func @transform_4(%arg0: i32) -> (i32, i32, i32) {
    %c0_i32 = arith.constant 0 : i32
    %c0_i32_0 = arith.constant 0 : i32
    %c0_i32_1 = arith.constant 0 : i32
    return %arg0, %c0_i32, %c0_i32_0 : i32, i32, i32
  }
  func.func @transform_5(%arg0: i32) -> (i32, i32, i32, i32) {
    %c0_i32 = arith.constant 0 : i32
    %c0_i32_0 = arith.constant 0 : i32
    %c0_i32_1 = arith.constant 0 : i32
    %c0_i32_2 = arith.constant 0 : i32
    return %arg0, %c0_i32, %c0_i32_0, %c0_i32_1 : i32, i32, i32, i32
  }
  func.func @transform_6(%arg0: i32) -> (i32, i32, i32, i32) {
    %c0_i32 = arith.constant 0 : i32
    %c0_i32_0 = arith.constant 0 : i32
    %c0_i32_1 = arith.constant 0 : i32
    %c0_i32_2 = arith.constant 0 : i32
    return %arg0, %c0_i32, %c0_i32_0, %c0_i32_1 : i32, i32, i32, i32
  }
  func.func @transform_7(%arg0: i32) -> (i32, i32, i32, i32) {
    %c0_i32 = arith.constant 0 : i32
    %c0_i32_0 = arith.constant 0 : i32
    %c0_i32_1 = arith.constant 0 : i32
    %c0_i32_2 = arith.constant 0 : i32
    return %arg0, %c0_i32, %c0_i32_0, %c0_i32_1 : i32, i32, i32, i32
  }
  func.func @transform_8(%arg0: i32) -> (i32, i32) {
    %c0_i32 = arith.constant 0 : i32
    %c0_i32_0 = arith.constant 0 : i32
    %c0_i32_1 = arith.constant 0 : i32
    return %c0_i32, %c0_i32_0 : i32, i32
  }
  func.func @transform_9(%arg0: i32) -> (i32, i32) {
    %c0_i32 = arith.constant 0 : i32
    %c0_i32_0 = arith.constant 0 : i32
    %c0_i32_1 = arith.constant 0 : i32
    return %c0_i32, %c0_i32_0 : i32, i32
  }
  func.func @transform_10(%arg0: i32) -> (i32, i32) {
    %c0_i32 = arith.constant 0 : i32
    %c0_i32_0 = arith.constant 0 : i32
    %c0_i32_1 = arith.constant 0 : i32
    return %c0_i32, %c0_i32_0 : i32, i32
  }
  func.func @transform_11(%arg0: i32) -> (i32, i32) {
    %c0_i32 = arith.constant 0 : i32
    %c0_i32_0 = arith.constant 0 : i32
    %c0_i32_1 = arith.constant 0 : i32
    return %c0_i32, %c0_i32_0 : i32, i32
  }
  func.func @transform_12(%arg0: i32) -> (i32, i32) {
    %c0_i32 = arith.constant 0 : i32
    %c0_i32_0 = arith.constant 0 : i32
    %c0_i32_1 = arith.constant 0 : i32
    return %c0_i32, %c0_i32_0 : i32, i32
  }
  func.func @transform_13(%arg0: i32) -> (i32, i32) {
    %c0_i32 = arith.constant 0 : i32
    %c0_i32_0 = arith.constant 0 : i32
    %c0_i32_1 = arith.constant 0 : i32
    return %c0_i32, %c0_i32_0 : i32, i32
  }
  func.func @transform_14(%arg0: i32) -> (i32, i32) {
    %c0_i32 = arith.constant 0 : i32
    %c0_i32_0 = arith.constant 0 : i32
    %c0_i32_1 = arith.constant 0 : i32
    return %c0_i32, %c0_i32_0 : i32, i32
  }
  func.func @transform_15(%arg0: i32) -> (i32, i32) {
    %c0_i32 = arith.constant 0 : i32
    %c0_i32_0 = arith.constant 0 : i32
    %c0_i32_1 = arith.constant 0 : i32
    return %c0_i32, %c0_i32_0 : i32, i32
  }
  func.func @transform_16(%arg0: i32) -> (i32, i32) {
    %c0_i32 = arith.constant 0 : i32
    %c0_i32_0 = arith.constant 0 : i32
    %c0_i32_1 = arith.constant 0 : i32
    return %c0_i32, %c0_i32_0 : i32, i32
  }
}

</mosaic_0001>

<bundles_post_ra>
// kernel: tpu_custom_call.1
= control target key start
LH: loop header
LB: loop body
LE: loop exit
PB: predicated region body
PF: predicated region fallthrough
CT: control target
= control target key end

     0   :  { %s3087_s0 = inlined_call_operand.vmem [shape: bf16[8,32,16], index: 0, kind: input, shape index: {}]   ;;  %s3088_s1 = inlined_call_operand.vmem [shape: bf16[32,32], index: 1, kind: input, shape index: {}]   ;;  %s3089_s2 = inlined_call_operand.hbm [shape: bf16[8,16,32], index: 2, kind: input, shape index: {}]   ;;  %s3090_s3 = inlined_call_operand.vmem [shape: f32[8,4,32], index: 3, kind: input, shape index: {}]   ;;  %s3091_s4 = inlined_call_operand.vmem [shape: bf16[8,32,32], index: 4, kind: input, shape index: {}]   ;;  %s3092_s5 = inlined_call_operand.vmem [shape: bf16[8,1,32,32], index: 5, kind: input, shape index: {}]   ;;  %s3093_s6 = inlined_call_operand.hbm [shape: f32[8,1,4,32], index: 6, kind: input, shape index: {}]   ;;  %s3094_s7 = inlined_call_operand.hbm [shape: bf16[8,1,32,32], index: 7, kind: input, shape index: {}]   ;;  %s3095_s8 = inlined_call_operand.vmem [shape: bf16[8,32], index: 8, kind: input, shape index: {}]   ;;  %s3096_s9 = inlined_call_operand.hbm [shape: bf16[32,128], index: 9, kind: input, shape index: {}]   ;;  %s3097_s10 = inlined_call_operand.vmem [shape: f32[1,128], index: 10, kind: input, shape index: {}]   ;;  %s3098_s11 = inlined_call_operand.vmem [shape: bf16[128,32], index: 11, kind: input, shape index: {}]   ;;  %s3099_s12 = inlined_call_operand.hbm [shape: bf16[32,32], index: 12, kind: input, shape index: {}]   ;;  %s3100_s13 = inlined_call_operand.vmem [shape: f32[1,32], index: 13, kind: input, shape index: {}]   ;;  %s3101_s14 = inlined_call_operand.vmem [shape: f32[32,1], index: 14, kind: input, shape index: {}]   ;;  %s3102_s15 = inlined_call_operand.<no memory space> [shape: f32[1,1], index: 15, kind: input, shape index: {}]   ;;  %s3103_s16 = inlined_call_operand.vmem [shape: f32[8,1], index: 16, kind: output, shape index: {}]  }
   0x1   :  { %3113 = sst [smem:[#allocation18_spill]] %s3087_s0  ;;  %v21_v0 = vstv %s3102_s15 }
   0x2   :  { %3114 = sst [smem:[#allocation19_spill]] %s3093_s6  ;;  %22 = vst [vmem:[#allocation3] sm:$0x1] %v21_v0 }
   0x3   :  { %3115 = sst [smem:[#allocation20_spill]] %s3096_s9 }
   0x4   :  { %3116 = sst [smem:[#allocation21_spill]] %s3097_s10 }
   0x5   :  { %3117 = sst [smem:[#allocation22_spill]] %s3098_s11 }
   0x6   :  { %3118 = sst [smem:[#allocation23_spill]] %s3099_s12 }
   0x7   :  { %3119 = sst [smem:[#allocation24_spill]] %s3100_s13 }
   0x8   :  { %3120 = sst [smem:[#allocation25_spill]] %s3101_s14 }
   0x9   :  { %3121 = sst [smem:[#allocation26_spill]] %s3103_s16 }
   0xa   :  { %23 = vsyncpa [#allocation5], 0 }
   0xb   :  { %25 = vsyncpa [#allocation5 + $0x1], 0 }
   0xc   :  { %26 = vsyncpa [#allocation7], 0 }
   0xd   :  { %28 = vsyncpa [#allocation7 + $0x1], 0 }
   0xe   :  { %29 = vsyncpa [#allocation10], 0  ;;  %s2699_s23 = smov 0   ;;  %s2701_s24 = smov 0  }
   0xf   :  { %s2703_s25 = smov 0   ;;  %s2705_s26 = smov 0  }
  0x10 LB: > { %3122 = sst [smem:[#allocation15_spill]] %s2595_s25  ;;  %s2718_s15 = sadd.s32 4294967295, %s2599_s26   ;;  %s2599_s26 = sphi %s2705_s26, %s3140_s26   ;;  %s2595_s25 = sphi %s2703_s25, %s3145_s25   ;;  %s2591_s24 = sphi %s2701_s24, %s3144_s24   ;;  %s2587_s23 = sphi %s2699_s23, %s3143_s23  }
  0x11   : > { %p102_p0 = scmp.ne.s32.totalorder %s2591_s24, %s2587_s23  ;;  %p103_p1 = scmp.eq.s32.totalorder %s2718_s15, 0 }
  0x12   : > { %p1991_p2 = scmp.ge.s32.totalorder %s2599_s26, 1  ;;  %p432_p3 = scmp.lt.s32.totalorder %s2599_s26, 5 }
  0x13   : > { %p1992_p4 = scmp.ne.s32.totalorder %s2718_s15, 0  ;;  %p2727_p5 = por %p103_p1, %p102_p0 }
  0x14   : > { %s3124_s9 = sld [smem:[#allocation20_spill]]  ;;  %p2734_p6 = pnand %p1991_p2, %p432_p3 }
  0x15   : > { %s2601_s17 = smov [#allocation9]   ;;  %s2747_s20 = sadd.s32 1, %s2599_s26  }
  0x16   : > { %p2258_p7 = pneg %p2734_p6  ;;  %s451_s18 = sshll.u32 %s2601_s17, 4  ;;  %s452_s18 = int_to_ptr.vmem [resolvable:$true] %s451_s18 }
  0x17   : > { %3127 = sst [smem:[#allocation16_spill]] %s2747_s20  ;;  %s3105_s21 = smov 64  }
  0x18   : > { %p2742_p8 = pnand %p2258_p7, %p103_p1  ;;  %s3107_s22 = smov 4  }
  0x19   : > { %s86_s23 = ssub.s32 %s2599_s26, %s2747_s20  ;;  %s89_s28 = sadd.s32 1, %s2595_s25 }
  0x1a   : > { %s449_s30 = sshll.u32 %s3124_s9, 4  ;;  %p87_p9 = scmp.eq.s32.totalorder %s86_s23, 0  ;;  %s450_s30 = int_to_ptr.hbm [resolvable:$true] %s449_s30 }
  0x1b   : > { %2261 = dma.hbm_to_vmem [thread:$0]  (!%p2742_p8), %s450_s30, 256, %s452_s18, [#allocation10], %s3105_s21, %s3105_s21, %s3107_s22  }
  0x1c   : > { %p96_p10 = scmp.ne.s32.totalorder %s2595_s25, %s2591_s24  ;;  %p97_p11 = scmp.eq.s32.totalorder %s2599_s26, 0 }
  0x1d   : > { %p2277_p12 = scmp.lt.s32.totalorder %s2599_s26, 4  ;;  %s2765_s17 = sand.u32 1, %s2595_s25  }
  0x1e   : > { %s2762_s29 = scalar_select %p87_p9, %s2595_s25, %s89_s28  }
  0x1f   : > { %p98_p13 = por %p97_p11, %p96_p10  ;;  %s556_s9 = sand.u32 1, %s2599_s26  }
  0x20   : > { %3128 = sst [smem:[#allocation17_spill]] %s2762_s29  ;;  %s1999_s16 = sshll.u32 %s2765_s17, 3 }
  0x21   : > { %p2769_p0 = pnand %p2277_p12, %p98_p13  ;;  %s2204_s30 = sshll.u32 %s2599_s26, 3 }
  0x22   : > { %s3130_s6 = sld [smem:[#allocation19_spill]]  ;;  %s560_s28 = scalar_lea.vmem [#allocation6], %s1999_s16 }
  0x23   : > { %s568_s29 = sshll.u32 %s560_s28, 4  ;;  %s2777_s25 = scalar_lea.sflag [#allocation7], %s556_s9  ;;  %s569_s29 = int_to_ptr.vmem [resolvable:$true] %s568_s29 }
  0x24   : > { %p2441_p3 = pneg %p2769_p0 }
  0x28   : > { %s565_s21 = scalar_lea.hbm %s3130_s6, %s2204_s30 }
  0x29   : > { %s566_s22 = sshll.u32 %s565_s21, 4  ;;  %s2444_s21 = scalar_lea.hbm %s3130_s6, 32  ;;  %s567_s22 = int_to_ptr.hbm [resolvable:$true] %s566_s22 }
  0x2a   : > { %s2437_s20 = sshra.s32 %s567_s22, 4  ;;  %s2438_s20 = int_to_ptr.hbm [resolvable:$true] %s2437_s20 }
  0x2b   : > { %s2439_s13 = scalar_lea.hbm %s2438_s20, 8  ;;  %p2445_p10 = scmp.lt.s32.totalorder %s2438_s20, %s3130_s6 }
  0x2c   : > { %p2440_p2 = scmp.ne.s32.totalorder %s2438_s20, %s2439_s13  ;;  %p2446_p11 = scmp.lt.s32.totalorder %s2444_s21, %s2439_s13 }
  0x2e   : > { %p2442_p7 = pnand %p2441_p3, %p2440_p2  ;;  %p2447_p12 = por %p2446_p11, %p2445_p10 }
  0x30   : > { %p2443_p9 = pneg %p2442_p7 }
  0x32   : > { %p2448_p13 = pnand %p2447_p12, %p2443_p9 }
  0x34   : > { %2451 = shalt.err (!%p2448_p13)
}
  0x35   : > { %s3131_s9 = smov 4   ;;  %s3132_s23 = smov 64  }
  0x36   : > { %2271 = dma.hbm_to_vmem [thread:$0]  (!%p2769_p0), %s567_s22, 128, %s569_s29, %s2777_s25, %s3132_s23, %s3132_s23, %s3131_s9  }
  0x37   : > { %s3133_s12 = sld [smem:[#allocation23_spill]]  ;;  %s2604_s13 = smov [#allocation11]  }
  0x38   : > { %s471_s20 = sshll.u32 %s2604_s13, 4  ;;  %s1995_s21 = sshll.u32 %s2765_s17, 4  ;;  %s472_s20 = int_to_ptr.vmem [resolvable:$true] %s471_s20 }
  0x39   : > { %s2203_s16 = sshll.u32 %s2599_s26, 4  ;;  %s508_s11 = scalar_lea.vmem [#allocation4], %s1995_s21 }
  0x3a   : > { %s514_s22 = scalar_lea.hbm %s3089_s2, %s2203_s16  ;;  %s517_s10 = sshll.u32 %s508_s11, 4  ;;  %s518_s10 = int_to_ptr.vmem [resolvable:$true] %s517_s10 }
  0x3b   : > { %s515_s29 = sshll.u32 %s514_s22, 4  ;;  %s505_s28 = scalar_lea.sflag [#allocation5], %s2765_s17  ;;  %s516_s29 = int_to_ptr.hbm [resolvable:$true] %s515_s29 }
  0x3c   : > { %s2497_s13 = sshra.s32 %s516_s29, 4  ;;  %s2498_s13 = int_to_ptr.hbm [resolvable:$true] %s2497_s13 }
  0x3d   : > { %s469_s18 = sshll.u32 %s3133_s12, 4  ;;  %s2499_s12 = scalar_lea.hbm %s2498_s13, 16  ;;  %s470_s18 = int_to_ptr.hbm [resolvable:$true] %s469_s18 }
  0x3e   : > { %2264 = dma.hbm_to_vmem [thread:$0]  (!%p2742_p8), %s470_s18, 256, %s472_s20, [#allocation10], %s3132_s23, %s3132_s23, %s3131_s9  }
  0x3f   : > { %p2500_p2 = scmp.ne.s32.totalorder %s2498_s13, %s2499_s12  ;;  %s2504_s20 = scalar_lea.hbm %s3089_s2, 64 }
  0x40   : > { %p2505_p9 = scmp.lt.s32.totalorder %s2498_s13, %s3089_s2  ;;  %p2506_p10 = scmp.lt.s32.totalorder %s2504_s20, %s2499_s12 }
  0x41   : > { %p2502_p7 = pnand %p2500_p2, %p2441_p3 }
  0x42   : > { %p2507_p11 = por %p2506_p10, %p2505_p9 }
  0x43   : > { %p2503_p8 = pneg %p2502_p7 }
  0x45   : > { %p2508_p12 = pnand %p2507_p11, %p2503_p8 }
  0x47   : > { %2511 = shalt.err (!%p2508_p12)
}
  0x48   : > { %2268 = dma.hbm_to_vmem [thread:$0]  (!%p2769_p0), %s516_s29, 256, %s518_s10, %s505_s28, %s3132_s23, %s3132_s23, %s3131_s9  }
  0x49   : > { %s2002_s11 = sshll.u32 %s2765_s17, 5  ;;  %s2206_s21 = sshll.u32 %s2599_s26, 5 }
  0x4a   : > { %s588_s19 = scalar_lea.hbm %s3094_s7, %s2206_s21  ;;  %s582_s12 = scalar_lea.vmem [#allocation8], %s2002_s11 }
  0x4b   : > { %s589_s13 = sshll.u32 %s588_s19, 4  ;;  %s591_s18 = sshll.u32 %s582_s12, 4  ;;  %s590_s13 = int_to_ptr.hbm [resolvable:$true] %s589_s13  ;;  %s592_s18 = int_to_ptr.vmem [resolvable:$true] %s591_s18 }
  0x4c   : > { %s2527_s20 = sshra.s32 %s590_s13, 4  ;;  %s2534_s26 = scalar_lea.hbm %s3094_s7, 128  ;;  %s2528_s20 = int_to_ptr.hbm [resolvable:$true] %s2527_s20 }
  0x4d   : > { %s2529_s6 = scalar_lea.hbm %s2528_s20, 32  ;;  %p2535_p8 = scmp.lt.s32.totalorder %s2528_s20, %s3094_s7 }
  0x4e   : > { %p2530_p13 = scmp.ne.s32.totalorder %s2528_s20, %s2529_s6  ;;  %p2536_p9 = scmp.lt.s32.totalorder %s2534_s26, %s2529_s6 }
  0x50   : > { %p2532_p2 = pnand %p2530_p13, %p2441_p3  ;;  %p2537_p10 = por %p2536_p9, %p2535_p8 }
  0x52   : > { %p2533_p7 = pneg %p2532_p2 }
  0x54   : > { %p2538_p11 = pnand %p2537_p10, %p2533_p7 }
  0x56   : > { %2541 = shalt.err (!%p2538_p11)
}
  0x57   : > { %2274 = dma.hbm_to_vmem [thread:$0]  (!%p2769_p0), %s590_s13, 512, %s592_s18, %s2777_s25, %s3132_s23, %s3132_s23, %s3131_s9  }
  0x58   : > { %603 = sbr.rel (%p2734_p6) target bundleno = 2469 (0x9a5), region = 84  ;;  %s605_s16 = sand.u32 (!%p2734_p6), 1, %s2591_s24  }
  0x59   : > { %s2007_s11 = sshll.u32 (!%p2734_p6), %s605_s16, 4  ;;  %s606_s21 = scalar_lea.sflag (!%p2734_p6), [#allocation5], %s605_s16 }
  0x5a   : > { %s2847_s30 = scalar_lea.vmem (!%p2734_p6), [#allocation4], %s2007_s11 }
  0x5d   : > { %2574 = dma.done.wait (%p2727_p5), %s606_s21, 256  }
  0x5e   : > { %2576 = vsyncadd (%p2727_p5), %s606_s21, 4294967040  ;;  %s615_s14 = sand.u32 1, %s2718_s15   ;;  %s2008_s22 = sshll.u32 %s605_s16, 3 }
  0x5f   : > { %s616_s25 = scalar_lea.sflag [#allocation7], %s615_s14  ;;  %s2854_s9 = scalar_lea.vmem [#allocation6], %s2008_s22 }
  0x60   : > { %2578 = dma.done.wait (%p2727_p5), %s616_s25, 640  }
  0x61   : > { %2580 = vsyncadd (%p2727_p5), %s616_s25, 4294966656  ;;  %s2009_s0 = sshll.u32 %s605_s16, 5 }
  0x62   : > { %s2860_s23 = scalar_lea.vmem [#allocation8], %s2009_s0 }
  0x63   : > { %2582 = dma.done.wait (%p103_p1), [#allocation10], 512  }
  0x64   : > { %2584 = vsyncadd (%p103_p1), [#allocation10], 4294966784  ;;  %s2012_s19 = sshll.u32 %s2718_s15, 1  ;;  %s3134_s6 = sld [smem:[#allocation18_spill]] }
  0x65   : > { %p718_p6 = scmp.lt.s32.totalorder %s2012_s19, 7 }
  0x66   : > { %751 = sbr.rel (%p1992_p4) target bundleno = 109 (0x6d), region = 108 }
  0x67   : > { %s3147_s19 = smov (!%p718_p6, %s2012_s19), 7 }
  0x68   : > { %s2207_s13 = sshll.u32 %s3147_s19, 4  ;;  %s2016_s12 = sshll.u32 %s3147_s19, 2 }
  0x69   : > { %s2873_s26 = scalar_lea.vmem %s3090_s3, %s2016_s12  ;;  %s2878_s16 = scalar_lea.vmem %s3091_s4, %s2207_s13 }
  0x6a   : > { %s722_s27 = scalar_lea.vmem %s3134_s6, %s2207_s13  ;;  %s2883_s14 = scalar_lea.vmem %s3092_s5, %s2207_s13 }
  0x6b   : > { %vm752_vm0 = vcmask 261120   ;;  %v2605_v1 = vmov 0.0  }
  0x6c   : > { %753 = vst.msk [vmem:[#allocation2] sm:$0xff] %vm752_vm0, %v2605_v1 }
  0x6d PF: > { %v2217_v2 = vld [vmem:[%s722_s27 + $0x18] sm:$0xff]  ;;  %s2606_s22 = smov 16   ;;  %v2216_v3 = vld [vmem:[%s722_s27 + $0x10] sm:$0xff]  ;;  %v2215_v4 = vld [vmem:[%s722_s27 + $0x8] sm:$0xff]  ;;  %vm797_vm1 = vcmask 130048   ;;  %vm816_vm2 = vcmask 261120  }
  0x6e   : > { %795 = vrot.lane.b32.xlu0 %v2217_v2, %s2606_s22  ;;  %v2214_v7 = vld [vmem:[%s722_s27] sm:$0xff]  ;;  %v2897_v11 = vld [vmem:[%s3088_s1 + $0x8] sm:$0xff]  ;;  %s2607_s12 = smov 112   ;;  %v2608_v25 = vmov 32.0   ;;  %s2610_s18 = smov 96  }
  0x6f   : > { %v2892_v10 = vld [vmem:[%s3088_s1] sm:$0xff]  ;;  %2324 = vrcp.f32 %v2608_v25  ;;  %s3135_s27 = sld [smem:[#allocation22_spill]]  ;;  %p2197_p1 = scmp.ne.s32.totalorder %s2718_s15, 3 }
  0x70   : > { %v2218_v12 = vld [vmem:[%s2847_s30] sm:$0xff]  ;;  %v2221_v13 = vld [vmem:[%s2847_s30 + $0x8] sm:$0xff]  ;;  %s2609_s30 = smov 32   ;;  %s3137_s20 = sld [smem:[#allocation24_spill]] }
  0x71   : > { %871 = vmatpush.bf16.msra.mxu1 %v2218_v12  ;;  %1032 = vmatpush.bf16.msra.mxu3 %v2221_v13  ;;  %v2910_v24 = vld [vmem:[%s2873_s26] sm:$0xf]  ;;  %v2220_v12 = vld [vmem:[%s2878_s16 + $0x8] sm:$0xff]  ;;  %s3138_s17 = sld [smem:[#allocation25_spill]] (!%p2197_p1) }
  0x72   : > { %v851_v26 = vperm.slane %v2910_v24, 0 }
  0x75   : > { %v2325_v31 = vpop.eup %2324 }
  0x76   : > { %793 = vrot.lane.b32.xlu0 %v2216_v3, %s2606_s22  ;;  %v897_v35 = vmul.f32 32.0, %v2325_v31  ;;  %vm901_vm3 = vweird.f32 %v2325_v31  ;;  %s3139_s22 = sld [smem:[#allocation26_spill]] (!%p2197_p1) }
  0x78   : > { %v898_v41 = vsub.f32 1.0, %v897_v35 }
  0x7a   : > { %v899_v44 = vmul.f32 %v2325_v31, %v898_v41 }
  0x7c   : > { %v900_v47 = vadd.f32 %v2325_v31, %v899_v44 }
  0x7e   : > { %v2917_v50 = vsel %vm901_vm3, %v2325_v31, %v900_v47 }
  0xe0   : > { %v796_v5 = vpop.permute.xlu0 %795 }
  0xe1   : > { %v804_v6 = vsel %vm797_vm1, %v2215_v4, %v796_v5 }
  0xe2   : > { %829 = vmatpush.bf16.msra.mxu0 %v804_v6  ;;  %2242 = vmatpush.bf16.msra.mxu2 %v804_v6 }
  0xe8   : > { %v794_v8 = vpop.permute.xlu0 %793 }
  0xe9   : > { %v800_v9 = vsel %vm797_vm1, %v2214_v7, %v794_v8 }
  0xea   : > { %830 = vmatpush.bf16.msra.mxu0 %v800_v9  ;;  %2243 = vmatpush.bf16.msra.mxu2 %v800_v9 }
  0xed   : > { %2052 = vmatmul.msk.bf16.vlgmr.msra.gmra.mxu0 %vm816_vm2, %v2892_v10  ;;  %2053 = vmatmul.msk.bf16.vlgmr.msra.gmra.mxu2 %vm816_vm2, %v2897_v11 }
  0xee   : > { %979 = vmatpush.bf16.msrb.mxu2 %v2220_v12 }
 0x16a   : > { %v832_v14 = vpop.f32.mrf.mxu0 }
 0x170   : > { %v837_v15 = vpop.f32.mrf.mxu2 }
 0x172   : > { %v834_v16 = vpop.f32.mrf.mxu0 }
 0x173   : > { %v849_v17 = vpack.c.bf16 %v834_v16, %v832_v14  ;;  %v2219_v14 = vld [vmem:[%s2878_s16] sm:$0xff] }
 0x174   : > { %980 = vmatpush.bf16.msrb.mxu2 %v2219_v14 }
 0x175   : > { %1009 = vrot.lane.b32.xlu1 %v849_v17, %s2607_s12  ;;  %2058 = vmatmul.msk.bf16.vlgmr.msra.gmra.mxu1 %vm797_vm1, %v849_v17 }
 0x178   : > { %v839_v18 = vpop.f32.mrf.mxu2 }
 0x179   : > { %v850_v19 = vpack.c.bf16 %v839_v18, %v837_v15 }
 0x17d   : > { %1011 = vrot.lane.b32.xlu1 %v850_v19, %s2607_s12 }
 0x185   : > { %2059 = vmatmul.msk.bf16.gmra.mxu1 %vm797_vm1, %v850_v19 }
 0x1e7   : > { %v1010_v20 = vpop.permute.xlu1 %1009 }
 0x1e8   : > { %2081 = vmatmul.msk.bf16.vlgmr.msra.gmra.mxu3 %vm797_vm1, %v1010_v20 }
 0x1ef   : > { %v1012_v22 = vpop.permute.xlu1 %1011 }
 0x1f2   : > { %v873_v21 = vpop.f32.mrf.mxu1 }
 0x1f3   : > { %v874_v29 = vadd.f32 %v873_v21, %v851_v26 }
 0x1f5   : > { %v883_v33 = vsel %vm816_vm2, %v874_v29, 0.0 }
 0x1f8   : > { %2082 = vmatmul.msk.bf16.gmra.mxu3 %vm797_vm1, %v1012_v22 }
 0x1fa   : > { %v875_v23 = vpop.f32.mrf.mxu1 }
 0x1fb   : > { %v876_v28 = vadd.f32 %v875_v23, %v851_v26 }
 0x1fd   : > { %v884_v32 = vsel %vm816_vm2, %v876_v28, 0.0 }
 0x1fe   : > { %v885_v36 = vadd.f32 %v884_v32, %v883_v33 }
 0x202   : > { %v878_v27 = vpop.f32.mrf.mxu1 }
 0x203   : > { %v879_v30 = vadd.f32 %v878_v27, %v851_v26 }
 0x205   : > { %v886_v34 = vsel %vm816_vm2, %v879_v30, 0.0 }
 0x206   : > { %v887_v39 = vadd.f32 %v886_v34, %v885_v36 }
 0x20a   : > { %v880_v37 = vpop.f32.mrf.mxu1 }
 0x20b   : > { %v881_v38 = vadd.f32 %v880_v37, %v851_v26  ;;  %v943_v26 = vperm.slane %v2910_v24, 2 }
 0x20d   : > { %v888_v40 = vsel %vm816_vm2, %v881_v38, 0.0 }
 0x20e   : > { %v889_v42 = vadd.f32 %v888_v40, %v887_v39 }
 0x210   : > { %v890_v43 = vrot.slane %v889_v42, 4 }
 0x212   : > { %v891_v45 = vadd.f32 %v890_v43, %v889_v42  ;;  %v2932_v43 = vld [vmem:[%s2873_s26 + $0x4] sm:$0xf] }
 0x213   : > { %v1006_v44 = vperm.slane %v2932_v43, 0 }
 0x214   : > { %v892_v46 = vrot.slane %v891_v45, 2 }
 0x216   : > { %v893_v48 = vadd.f32 %v892_v46, %v891_v45 }
 0x218   : > { %v894_v49 = vrot.slane %v893_v48, 1 }
 0x21a   : > { %v895_v51 = vadd.f32 %v894_v49, %v893_v48 }
 0x21c   : > { %v903_v52 = vmul.f32 %v2917_v50, %v895_v51 }
 0x21e   : > { %v904_v53 = vsub.f32 %v874_v29, %v903_v52  ;;  %v905_v54 = vsub.f32 %v876_v28, %v903_v52  ;;  %v906_v55 = vsub.f32 %v879_v30, %v903_v52  ;;  %v907_v56 = vsub.f32 %v881_v38, %v903_v52 }
 0x220   : > { %v908_v57 = vmul.f32 %v904_v53, %v904_v53  ;;  %v909_v58 = vmul.f32 %v905_v54, %v905_v54  ;;  %v910_v59 = vmul.f32 %v906_v55, %v906_v55  ;;  %v911_v60 = vmul.f32 %v907_v56, %v907_v56 }
 0x222   : > { %v912_v61 = vsel %vm816_vm2, %v908_v57, 0.0  ;;  %v913_v62 = vsel %vm816_vm2, %v909_v58, 0.0  ;;  %v915_v0 = vsel %vm816_vm2, %v910_v59, 0.0  ;;  %v917_v2 = vsel %vm816_vm2, %v911_v60, 0.0 }
 0x223   : > { %v914_v63 = vadd.f32 %v913_v62, %v912_v61 }
 0x225   : > { %v916_v1 = vadd.f32 %v915_v0, %v914_v63 }
 0x227   : > { %v918_v3 = vadd.f32 %v917_v2, %v916_v1 }
 0x229   : > { %v919_v4 = vrot.slane %v918_v3, 4 }
 0x22b   : > { %v920_v5 = vadd.f32 %v919_v4, %v918_v3 }
 0x22d   : > { %v921_v6 = vrot.slane %v920_v5, 2 }
 0x22f   : > { %v922_v7 = vadd.f32 %v921_v6, %v920_v5 }
 0x231   : > { %v923_v8 = vrot.slane %v922_v7, 1 }
 0x233   : > { %v924_v9 = vadd.f32 %v923_v8, %v922_v7 }
 0x235   : > { %v925_v13 = vmul.f32 %v924_v9, %v2917_v50 }
 0x237   : > { %v926_v15 = vadd.f32 1e-05, %v925_v13 }
 0x239   : > { %2326 = vrsqrt.f32 %v926_v15  ;;  %vm933_vm5 = vweird.f32 %v926_v15 }
 0x23f   : > { %v2327_v16 = vpop.eup %2326 }
 0x240   : > { %v928_v17 = vmul.f32 %v2327_v16, %v926_v15  ;;  %vm934_vm4 = vweird.f32 %v2327_v16 }
 0x241   : > { %vm935_vm6 = vmor %vm933_vm5, %vm934_vm4 }
 0x242   : > { %v929_v18 = vmul.f32 %v2327_v16, %v928_v17 }
 0x244   : > { %v930_v19 = vmul.f32 0.5, %v929_v18 }
 0x246   : > { %v931_v20 = vsub.f32 1.5, %v930_v19 }
 0x248   : > { %v932_v21 = vmul.f32 %v2327_v16, %v931_v20 }
 0x24a   : > { %v936_v22 = vsel %vm935_vm6, %v2327_v16, %v932_v21 }
 0x24b   : > { %v937_v23 = vmul.f32 %v936_v22, %v2910_v24 }
 0x24d   : > { %v938_v25 = vperm.slane %v937_v23, 1 }
 0x24f   : > { %v939_v27 = vmul.f32 %v938_v25, %v904_v53  ;;  %v940_v28 = vmul.f32 %v938_v25, %v905_v54  ;;  %v942_v32 = vmul.f32 %v938_v25, %v907_v56  ;;  %v941_v34 = vmul.f32 %v938_v25, %v906_v55 }
 0x251   : > { %v944_v29 = vadd.f32 %v943_v26, %v939_v27  ;;  %v945_v30 = vadd.f32 %v943_v26, %v940_v28  ;;  %v947_v36 = vadd.f32 %v943_v26, %v942_v32  ;;  %v946_v37 = vadd.f32 %v943_v26, %v941_v34  ;;  %v2223_v26 = vld [vmem:[%s2878_s16 + $0x18] sm:$0xff]  ;;  %v2222_v28 = vld [vmem:[%s2878_s16 + $0x10] sm:$0xff] }
 0x252   : > { %1133 = vmatpush.bf16.msrb.mxu1 %v2223_v26 }
 0x253   : > { %2328 = vtanh.f32 %v944_v29 }
 0x254   : > { %2330 = vtanh.f32 %v945_v30 }
 0x255   : > { %2332 = vtanh.f32 %v947_v36 }
 0x256   : > { %2334 = vtanh.f32 %v946_v37  ;;  %1134 = vmatpush.bf16.msrb.mxu1 %v2222_v28 }
 0x259   : > { %v2329_v31 = vpop.eup %2328 }
 0x25a   : > { %v2331_v33 = vpop.eup %2330 }
 0x25b   : > { %v952_v35 = vpack.c.bf16 %v2331_v33, %v2329_v31  ;;  %v2333_v38 = vpop.eup %2332 }
 0x25c   : > { %v2335_v39 = vpop.eup %2334 }
 0x25d   : > { %2068 = vmatmul.msk.bf16.vlgmr.msrb.gmra.mxu2 %vm816_vm2, %v952_v35  ;;  %v953_v41 = vpack.c.bf16 %v2333_v38, %v2335_v39  ;;  %v1097_v39 = vperm.slane %v2932_v43, 2 }
 0x26b   : > { %v1034_v40 = vpop.f32.mrf.mxu3 }
 0x26c   : > { %v1035_v47 = vadd.f32 %v1034_v40, %v1006_v44 }
 0x26d   : > { %2069 = vmatmul.msk.bf16.gmra.mxu2 %vm816_vm2, %v953_v41 }
 0x26e   : > { %v1044_v51 = vsel %vm816_vm2, %v1035_v47, 0.0 }
 0x273   : > { %v1036_v42 = vpop.f32.mrf.mxu3 }
 0x274   : > { %v1037_v46 = vadd.f32 %v1036_v42, %v1006_v44 }
 0x276   : > { %v1045_v49 = vsel %vm816_vm2, %v1037_v46, 0.0 }
 0x277   : > { %v1046_v53 = vadd.f32 %v1045_v49, %v1044_v51 }
 0x27b   : > { %v1039_v45 = vpop.f32.mrf.mxu3 }
 0x27c   : > { %v1040_v48 = vadd.f32 %v1039_v45, %v1006_v44 }
 0x27e   : > { %v1047_v52 = vsel %vm816_vm2, %v1040_v48, 0.0 }
 0x27f   : > { %v1048_v56 = vadd.f32 %v1047_v52, %v1046_v53 }
 0x283   : > { %v1041_v54 = vpop.f32.mrf.mxu3 }
 0x284   : > { %v1042_v55 = vadd.f32 %v1041_v54, %v1006_v44 }
 0x286   : > { %v1049_v57 = vsel %vm816_vm2, %v1042_v55, 0.0 }
 0x287   : > { %v1050_v58 = vadd.f32 %v1049_v57, %v1048_v56 }
 0x289   : > { %v1051_v59 = vrot.slane %v1050_v58, 4 }
 0x28b   : > { %v1052_v60 = vadd.f32 %v1051_v59, %v1050_v58  ;;  %v1108_v59 = vperm.slane %v2932_v43, 3 }
 0x28d   : > { %v1053_v61 = vrot.slane %v1052_v60, 2 }
 0x28f   : > { %v1054_v62 = vadd.f32 %v1053_v61, %v1052_v60 }
 0x291   : > { %v1055_v63 = vrot.slane %v1054_v62, 1 }
 0x293   : > { %v1056_v0 = vadd.f32 %v1055_v63, %v1054_v62 }
 0x295   : > { %v1057_v1 = vmul.f32 %v1056_v0, %v2917_v50 }
 0x297   : > { %v1058_v2 = vsub.f32 %v1035_v47, %v1057_v1  ;;  %v1059_v3 = vsub.f32 %v1037_v46, %v1057_v1  ;;  %v1060_v4 = vsub.f32 %v1040_v48, %v1057_v1  ;;  %v1061_v5 = vsub.f32 %v1042_v55, %v1057_v1 }
 0x299   : > { %v1062_v6 = vmul.f32 %v1058_v2, %v1058_v2  ;;  %v1063_v7 = vmul.f32 %v1059_v3, %v1059_v3  ;;  %v1064_v8 = vmul.f32 %v1060_v4, %v1060_v4  ;;  %v1065_v9 = vmul.f32 %v1061_v5, %v1061_v5 }
 0x29b   : > { %v1066_v12 = vsel %vm816_vm2, %v1062_v6, 0.0  ;;  %v1067_v13 = vsel %vm816_vm2, %v1063_v7, 0.0  ;;  %v1069_v15 = vsel %vm816_vm2, %v1064_v8, 0.0  ;;  %v1071_v17 = vsel %vm816_vm2, %v1065_v9, 0.0 }
 0x29c   : > { %v1068_v14 = vadd.f32 %v1067_v13, %v1066_v12 }
 0x29e   : > { %v1070_v16 = vadd.f32 %v1069_v15, %v1068_v14 }
 0x2a0   : > { %v1072_v18 = vadd.f32 %v1071_v17, %v1070_v16 }
 0x2a2   : > { %v1073_v19 = vrot.slane %v1072_v18, 4 }
 0x2a4   : > { %v1074_v20 = vadd.f32 %v1073_v19, %v1072_v18 }
 0x2a6   : > { %v1075_v21 = vrot.slane %v1074_v20, 2 }
 0x2a8   : > { %v1076_v22 = vadd.f32 %v1075_v21, %v1074_v20  ;;  %v954_v20 = vperm.slane %v2910_v24, 3 }
 0x2aa   : > { %v1077_v23 = vrot.slane %v1076_v22, 1 }
 0x2ac   : > { %v1078_v25 = vadd.f32 %v1077_v23, %v1076_v22 }
 0x2ae   : > { %v1079_v27 = vmul.f32 %v1078_v25, %v2917_v50 }
 0x2b0   : > { %v1080_v29 = vadd.f32 1e-05, %v1079_v27 }
 0x2b2   : > { %2336 = vrsqrt.f32 %v1080_v29  ;;  %vm1087_vm8 = vweird.f32 %v1080_v29 }
 0x2b8   : > { %v2337_v30 = vpop.eup %2336 }
 0x2b9   : > { %v1082_v31 = vmul.f32 %v2337_v30, %v1080_v29  ;;  %vm1088_vm7 = vweird.f32 %v2337_v30 }
 0x2ba   : > { %vm1089_vm9 = vmor %vm1087_vm8, %vm1088_vm7 }
 0x2bb   : > { %v1083_v32 = vmul.f32 %v2337_v30, %v1082_v31 }
 0x2bd   : > { %v1084_v33 = vmul.f32 0.5, %v1083_v32 }
 0x2bf   : > { %v1085_v34 = vsub.f32 1.5, %v1084_v33 }
 0x2c1   : > { %v1086_v35 = vmul.f32 %v2337_v30, %v1085_v34 }
 0x2c3   : > { %v1090_v36 = vsel %vm1089_vm9, %v2337_v30, %v1086_v35 }
 0x2c4   : > { %v1091_v37 = vmul.f32 %v2932_v43, %v1090_v36 }
 0x2c6   : > { %v1092_v38 = vperm.slane %v1091_v37, 1 }
 0x2c8   : > { %v1093_v40 = vmul.f32 %v1092_v38, %v1058_v2  ;;  %v1094_v41 = vmul.f32 %v1092_v38, %v1059_v3  ;;  %v1096_v46 = vmul.f32 %v1092_v38, %v1061_v5  ;;  %v1095_v48 = vmul.f32 %v1092_v38, %v1060_v4 }
 0x2ca   : > { %v1098_v42 = vadd.f32 %v1097_v39, %v1093_v40  ;;  %v1099_v44 = vadd.f32 %v1097_v39, %v1094_v41  ;;  %v1101_v51 = vadd.f32 %v1097_v39, %v1096_v46  ;;  %v1100_v52 = vadd.f32 %v1097_v39, %v1095_v48  ;;  %v2229_v46 = vld [vmem:[%s2883_s14 + $0x18] sm:$0xff] }
 0x2cb   : > { %1407 = vmatpush.bf16.msra.mxu1 %v2229_v46 }
 0x2cc   : > { %2338 = vtanh.f32 %v1098_v42 }
 0x2cd   : > { %2340 = vtanh.f32 %v1099_v44  ;;  %v2225_v44 = vld [vmem:[%s2883_s14 + $0x8] sm:$0xff] }
 0x2ce   : > { %2342 = vtanh.f32 %v1101_v51  ;;  %1245 = vmatpush.bf16.msrb.mxu0 %v2225_v44 }
 0x2cf   : > { %2344 = vtanh.f32 %v1100_v52 }
 0x2d2   : > { %v2339_v45 = vpop.eup %2338 }
 0x2d3   : > { %v2341_v47 = vpop.eup %2340 }
 0x2d4   : > { %v1106_v49 = vpack.c.bf16 %v2341_v47, %v2339_v45  ;;  %v2343_v53 = vpop.eup %2342  ;;  %v2224_v45 = vld [vmem:[%s2883_s14] sm:$0xff]  ;;  %v2228_v47 = vld [vmem:[%s2883_s14 + $0x10] sm:$0xff] }
 0x2d5   : > { %v2345_v54 = vpop.eup %2344  ;;  %1246 = vmatpush.bf16.msrb.mxu0 %v2224_v45  ;;  %1408 = vmatpush.bf16.msra.mxu1 %v2228_v47 }
 0x2d6   : > { %2091 = vmatmul.msk.bf16.vlgmr.msrb.gmra.mxu1 %vm816_vm2, %v1106_v49  ;;  %v1107_v55 = vpack.c.bf16 %v2343_v53, %v2345_v54 }
 0x2e0   : > { %v982_v16 = vpop.f32.mrf.mxu2 }
 0x2e1   : > { %v983_v26 = vadd.f32 %v982_v16, %v954_v20 }
 0x2e6   : > { %2092 = vmatmul.msk.bf16.gmra.mxu1 %vm816_vm2, %v1107_v55 }
 0x2e8   : > { %v984_v17 = vpop.f32.mrf.mxu2 }
 0x2e9   : > { %v985_v23 = vadd.f32 %v984_v17, %v954_v20 }
 0x2f0   : > { %v987_v18 = vpop.f32.mrf.mxu2 }
 0x2f1   : > { %v988_v22 = vadd.f32 %v987_v18, %v954_v20 }
 0x2f8   : > { %v989_v19 = vpop.f32.mrf.mxu2 }
 0x2f9   : > { %v990_v21 = vadd.f32 %v989_v19, %v954_v20 }
 0x353   : > { %v1136_v56 = vpop.f32.mrf.mxu1 }
 0x354   : > { %v1137_v0 = vadd.f32 %v1136_v56, %v1108_v59 }
 0x35b   : > { %v1138_v57 = vpop.f32.mrf.mxu1 }
 0x35c   : > { %v1139_v62 = vadd.f32 %v1138_v57, %v1108_v59  ;;  %v2972_v57 = vld [vmem:[%s2854_s9] sm:$0xf] }
 0x363   : > { %v1141_v58 = vpop.f32.mrf.mxu1 }
 0x364   : > { %v1142_v60 = vadd.f32 %v1141_v58, %v1108_v59  ;;  %v1220_v58 = vperm.slane %v2972_v57, 0 }
 0x366   : > { %2346 = vtanh.f32 %v1142_v60 }
 0x36b   : > { %v1143_v61 = vpop.f32.mrf.mxu1 }
 0x36c   : > { %v1144_v63 = vadd.f32 %v1143_v61, %v1108_v59  ;;  %v2347_v1 = vpop.eup %2346 }
 0x36d   : > { %v1156_v2 = vpack.c.bf16 %v2347_v1, %v2347_v1 }
 0x36e   : > { %2348 = vtanh.f32 %v1144_v63 }
 0x36f   : > { %2350 = vtanh.f32 %v1139_v62  ;;  %v1174_v6 = vunpack.c.l.b16 %v1156_v2 }
 0x370   : > { %2352 = vtanh.f32 %v1137_v0 }
 0x371   : > { %2354 = vtanh.f32 %v990_v21 }
 0x372   : > { %2356 = vtanh.f32 %v988_v22 }
 0x373   : > { %2358 = vtanh.f32 %v985_v23 }
 0x374   : > { %v2349_v3 = vpop.eup %2348  ;;  %2360 = vtanh.f32 %v983_v26 }
 0x375   : > { %v1157_v4 = vpack.c.bf16 %v2349_v3, %v2349_v3  ;;  %v2351_v5 = vpop.eup %2350 }
 0x376   : > { %v2353_v8 = vpop.eup %2352  ;;  %v1155_v9 = vpack.c.bf16 %v2351_v5, %v2351_v5 }
 0x377   : > { %v1175_v7 = vunpack.c.l.b16 %v1157_v4  ;;  %v1154_v43 = vpack.c.bf16 %v2353_v8, %v2353_v8  ;;  %v2355_v25 = vpop.eup %2354 }
 0x378   : > { %v1173_v13 = vunpack.c.l.b16 %v1155_v9  ;;  %v2357_v27 = vpop.eup %2356  ;;  %v1153_v28 = vpack.c.bf16 %v2355_v25, %v2355_v25 }
 0x379   : > { %v1177_v12 = vpack.c.b16 %v1175_v7, %v1174_v6  ;;  %v1172_v14 = vunpack.c.l.b16 %v1154_v43  ;;  %v1152_v29 = vpack.c.bf16 %v2357_v27, %v2357_v27  ;;  %v2359_v31 = vpop.eup %2358 }
 0x37a   : > { %v1165_v30 = vunpack.c.l.b16 %v1153_v28  ;;  %v2361_v33 = vpop.eup %2360  ;;  %v1151_v34 = vpack.c.bf16 %v2359_v31, %v2359_v31 }
 0x37b   : > { %1180 = vrot.lane.b32.xlu2 %v1177_v12, %s2609_s30  ;;  %v1176_v15 = vpack.c.b16 %v1173_v13, %v1172_v14  ;;  %v1164_v32 = vunpack.c.l.b16 %v1152_v29  ;;  %v1150_v36 = vpack.c.bf16 %v2361_v33, %v2361_v33 }
 0x37c   : > { %v1163_v38 = vunpack.c.l.b16 %v1151_v34 }
 0x37d   : > { %v1167_v24 = vpack.c.b16 %v1165_v30, %v1164_v32  ;;  %v1162_v39 = vunpack.c.l.b16 %v1150_v36 }
 0x37f   : > { %v1166_v40 = vpack.c.b16 %v1163_v38, %v1162_v39  ;;  %v2226_v39 = vld [vmem:[%s2860_s23] sm:$0xff] }
 0x383   : > { %1178 = vrot.lane.b32.xlu2 %v1176_v15, %s2609_s30 }
 0x3d5   : > { %v1181_v35 = vpop.permute.xlu2 %1180 }
 0x3d6   : > { %v1188_v37 = vsel %vm816_vm2, %v1167_v24, %v1181_v35 }
 0x3d7   : > { %1196 = vmatpush.bf16.msrb.mxu3 %v1188_v37  ;;  %v2227_v37 = vld [vmem:[%s2860_s23 + $0x8] sm:$0xff] }
 0x3d8   : > { %1347 = vmatpush.bf16.msra.mxu2 %v2227_v37 }
 0x3dc   : > { %1348 = vmatpush.bf16.msra.mxu2 %v2226_v39 }
 0x3dd   : > { %v1179_v41 = vpop.permute.xlu2 %1178 }
 0x3de   : > { %v1184_v42 = vsel %vm816_vm2, %v1166_v40, %v1179_v41 }
 0x3df   : > { %1197 = vmatpush.bf16.msrb.mxu3 %v1184_v42 }
 0x3e2   : > { %2093 = vmatmul.msk.bf16.vlgmr.msrb.gmra.mxu3 %vm816_vm2, %v2892_v10 }
 0x3f2   : > { %2094 = vmatmul.msk.bf16.gmra.mxu3 %vm816_vm2, %v2897_v11 }
 0x465   : > { %v1199_v48 = vpop.f32.mrf.mxu3 }
 0x46d   : > { %v1201_v49 = vpop.f32.mrf.mxu3 }
 0x46e   : > { %v1218_v51 = vpack.c.bf16 %v1201_v49, %v1199_v48 }
 0x470   : > { %1379 = vrot.lane.b32.xlu0 %v1218_v51, %s2610_s18  ;;  %2103 = vmatmul.msk.bf16.vlgmr.msrb.gmra.mxu0 %vm816_vm2, %v1218_v51 }
 0x475   : > { %v1204_v10 = vpop.f32.mrf.mxu3 }
 0x47d   : > { %v1206_v52 = vpop.f32.mrf.mxu3 }
 0x47e   : > { %v1219_v11 = vpack.c.bf16 %v1206_v52, %v1204_v10  ;;  %v1311_v10 = vperm.slane %v2972_v57, 2 }
 0x480   : > { %1381 = vrot.lane.b32.xlu1 %v1219_v11, %s2610_s18  ;;  %2104 = vmatmul.msk.bf16.gmra.mxu0 %vm816_vm2, %v1219_v11 }
 0x4e2   : > { %v1380_v53 = vpop.permute.xlu0 %1379 }
 0x4e3   : > { %2132 = vmatmul.msk.bf16.vlgmr.msra.gmra.mxu1 %vm816_vm2, %v1380_v53 }
 0x4ed   : > { %v1248_v54 = vpop.f32.mrf.mxu0 }
 0x4ee   : > { %v1249_v61 = vadd.f32 %v1248_v54, %v1220_v58 }
 0x4f0   : > { %v1258_v0 = vsel %vm816_vm2, %v1249_v61, 0.0 }
 0x4f2   : > { %v1382_v55 = vpop.permute.xlu1 %1381 }
 0x4f3   : > { %2133 = vmatmul.msk.bf16.gmra.mxu1 %vm816_vm2, %v1382_v55 }
 0x4f5   : > { %v1250_v56 = vpop.f32.mrf.mxu0 }
 0x4f6   : > { %v1251_v60 = vadd.f32 %v1250_v56, %v1220_v58 }
 0x4f8   : > { %v1259_v63 = vsel %vm816_vm2, %v1251_v60, 0.0 }
 0x4f9   : > { %v1260_v2 = vadd.f32 %v1259_v63, %v1258_v0 }
 0x4fd   : > { %v1253_v59 = vpop.f32.mrf.mxu0 }
 0x4fe   : > { %v1254_v62 = vadd.f32 %v1253_v59, %v1220_v58 }
 0x500   : > { %v1261_v1 = vsel %vm816_vm2, %v1254_v62, 0.0 }
 0x501   : > { %v1262_v5 = vadd.f32 %v1261_v1, %v1260_v2 }
 0x505   : > { %v1255_v3 = vpop.f32.mrf.mxu0 }
 0x506   : > { %v1256_v4 = vadd.f32 %v1255_v3, %v1220_v58 }
 0x508   : > { %v1263_v6 = vsel %vm816_vm2, %v1256_v4, 0.0 }
 0x509   : > { %v1264_v7 = vadd.f32 %v1263_v6, %v1262_v5 }
 0x50b   : > { %v1265_v8 = vrot.slane %v1264_v7, 4 }
 0x50d   : > { %v1266_v9 = vadd.f32 %v1265_v8, %v1264_v7 }
 0x50f   : > { %v1267_v12 = vrot.slane %v1266_v9, 2 }
 0x511   : > { %v1268_v43 = vadd.f32 %v1267_v12, %v1266_v9 }
 0x513   : > { %v1269_v13 = vrot.slane %v1268_v43, 1 }
 0x515   : > { %v1270_v14 = vadd.f32 %v1269_v13, %v1268_v43 }
 0x517   : > { %v1271_v15 = vmul.f32 %v1270_v14, %v2917_v50 }
 0x519   : > { %v1272_v16 = vsub.f32 %v1249_v61, %v1271_v15  ;;  %v1273_v17 = vsub.f32 %v1251_v60, %v1271_v15  ;;  %v1274_v18 = vsub.f32 %v1254_v62, %v1271_v15  ;;  %v1275_v19 = vsub.f32 %v1256_v4, %v1271_v15  ;;  %v2992_v4 = vld [vmem:[%s2854_s9 + $0x4] sm:$0xf] }
 0x51a   : > { %v1376_v5 = vperm.slane %v2992_v4, 0 }
 0x51b   : > { %v1276_v20 = vmul.f32 %v1272_v16, %v1272_v16  ;;  %v1277_v21 = vmul.f32 %v1273_v17, %v1273_v17  ;;  %v1278_v22 = vmul.f32 %v1274_v18, %v1274_v18  ;;  %v1279_v23 = vmul.f32 %v1275_v19, %v1275_v19 }
 0x51d   : > { %v1280_v25 = vsel %vm816_vm2, %v1276_v20, 0.0  ;;  %v1281_v26 = vsel %vm816_vm2, %v1277_v21, 0.0  ;;  %v1283_v28 = vsel %vm816_vm2, %v1278_v22, 0.0  ;;  %v1285_v30 = vsel %vm816_vm2, %v1279_v23, 0.0 }
 0x51e   : > { %v1282_v27 = vadd.f32 %v1281_v26, %v1280_v25 }
 0x520   : > { %v1284_v29 = vadd.f32 %v1283_v28, %v1282_v27 }
 0x522   : > { %v1286_v31 = vadd.f32 %v1285_v30, %v1284_v29 }
 0x524   : > { %v1287_v32 = vrot.slane %v1286_v31, 4 }
 0x526   : > { %v1288_v33 = vadd.f32 %v1287_v32, %v1286_v31 }
 0x528   : > { %v1289_v34 = vrot.slane %v1288_v33, 2 }
 0x52a   : > { %v1290_v24 = vadd.f32 %v1289_v34, %v1288_v33 }
 0x52c   : > { %v1291_v35 = vrot.slane %v1290_v24, 1 }
 0x52e   : > { %v1292_v36 = vadd.f32 %v1291_v35, %v1290_v24 }
 0x530   : > { %v1293_v38 = vmul.f32 %v1292_v36, %v2917_v50 }
 0x532   : > { %v1294_v40 = vadd.f32 1e-05, %v1293_v38 }
 0x534   : > { %2362 = vrsqrt.f32 %v1294_v40  ;;  %vm1301_vm11 = vweird.f32 %v1294_v40 }
 0x53a   : > { %v2363_v41 = vpop.eup %2362 }
 0x53b   : > { %v1296_v42 = vmul.f32 %v2363_v41, %v1294_v40  ;;  %vm1302_vm10 = vweird.f32 %v2363_v41 }
 0x53c   : > { %vm1303_vm12 = vmor %vm1301_vm11, %vm1302_vm10 }
 0x53d   : > { %v1297_v44 = vmul.f32 %v2363_v41, %v1296_v42 }
 0x53f   : > { %v1298_v45 = vmul.f32 0.5, %v1297_v44 }
 0x541   : > { %v1299_v46 = vsub.f32 1.5, %v1298_v45 }
 0x543   : > { %v1300_v47 = vmul.f32 %v2363_v41, %v1299_v46 }
 0x545   : > { %v1304_v48 = vsel %vm1303_vm12, %v2363_v41, %v1300_v47 }
 0x546   : > { %v1305_v49 = vmul.f32 %v1304_v48, %v2972_v57 }
 0x548   : > { %v1306_v51 = vperm.slane %v1305_v49, 1  ;;  %v2231_v49 = vld [vmem:[%s2860_s23 + $0x18] sm:$0xff] }
 0x549   : > { %1509 = vmatpush.bf16.msra.mxu3 %v2231_v49 }
 0x54a   : > { %v1307_v52 = vmul.f32 %v1306_v51, %v1272_v16  ;;  %v1308_v11 = vmul.f32 %v1306_v51, %v1273_v17  ;;  %v1310_v56 = vmul.f32 %v1306_v51, %v1275_v19  ;;  %v1309_v59 = vmul.f32 %v1306_v51, %v1274_v18 }
 0x54c   : > { %v1312_v53 = vadd.f32 %v1311_v10, %v1307_v52  ;;  %v1313_v54 = vadd.f32 %v1311_v10, %v1308_v11  ;;  %v1315_v61 = vadd.f32 %v1311_v10, %v1310_v56  ;;  %v1314_v62 = vadd.f32 %v1311_v10, %v1309_v59  ;;  %v2230_v10 = vld [vmem:[%s2860_s23 + $0x10] sm:$0xff] }
 0x54d   : > { %1510 = vmatpush.bf16.msra.mxu3 %v2230_v10 }
 0x54e   : > { %2364 = vtanh.f32 %v1312_v53 }
 0x54f   : > { %2366 = vtanh.f32 %v1313_v54 }
 0x550   : > { %2368 = vtanh.f32 %v1315_v61 }
 0x551   : > { %2370 = vtanh.f32 %v1314_v62 }
 0x554   : > { %v2365_v55 = vpop.eup %2364 }
 0x555   : > { %v2367_v58 = vpop.eup %2366 }
 0x556   : > { %v1320_v60 = vpack.c.bf16 %v2367_v58, %v2365_v55  ;;  %v2369_v0 = vpop.eup %2368 }
 0x557   : > { %v2371_v1 = vpop.eup %2370 }
 0x558   : > { %2113 = vmatmul.msk.bf16.vlgmr.msra.gmra.mxu2 %vm816_vm2, %v1320_v60  ;;  %v1321_v2 = vpack.c.bf16 %v2369_v0, %v2371_v1 }
 0x560   : > { %v1410_v63 = vpop.f32.mrf.mxu1 }
 0x561   : > { %v1411_v8 = vadd.f32 %v1410_v63, %v1376_v5 }
 0x563   : > { %v1420_v43 = vsel %vm816_vm2, %v1411_v8, 0.0 }
 0x568   : > { %v1412_v3 = vpop.f32.mrf.mxu1  ;;  %2114 = vmatmul.msk.bf16.gmra.mxu2 %vm816_vm2, %v1321_v2 }
 0x569   : > { %v1413_v7 = vadd.f32 %v1412_v3, %v1376_v5 }
 0x56b   : > { %v1421_v12 = vsel %vm816_vm2, %v1413_v7, 0.0 }
 0x56c   : > { %v1422_v14 = vadd.f32 %v1421_v12, %v1420_v43 }
 0x570   : > { %v1415_v6 = vpop.f32.mrf.mxu1 }
 0x571   : > { %v1416_v9 = vadd.f32 %v1415_v6, %v1376_v5 }
 0x573   : > { %v1423_v13 = vsel %vm816_vm2, %v1416_v9, 0.0 }
 0x574   : > { %v1424_v17 = vadd.f32 %v1423_v13, %v1422_v14  ;;  %v1484_v14 = vperm.slane %v2992_v4, 3 }
 0x578   : > { %v1417_v15 = vpop.f32.mrf.mxu1 }
 0x579   : > { %v1418_v16 = vadd.f32 %v1417_v15, %v1376_v5 }
 0x57b   : > { %v1425_v18 = vsel %vm816_vm2, %v1418_v16, 0.0 }
 0x57c   : > { %v1426_v19 = vadd.f32 %v1425_v18, %v1424_v17 }
 0x57e   : > { %v1427_v20 = vrot.slane %v1426_v19, 4 }
 0x580   : > { %v1428_v21 = vadd.f32 %v1427_v20, %v1426_v19 }
 0x582   : > { %v1429_v22 = vrot.slane %v1428_v21, 2 }
 0x584   : > { %v1430_v23 = vadd.f32 %v1429_v22, %v1428_v21 }
 0x586   : > { %v1431_v25 = vrot.slane %v1430_v23, 1 }
 0x588   : > { %v1432_v26 = vadd.f32 %v1431_v25, %v1430_v23 }
 0x58a   : > { %v1433_v27 = vmul.f32 %v1432_v26, %v2917_v50 }
 0x58c   : > { %v1434_v28 = vsub.f32 %v1411_v8, %v1433_v27  ;;  %v1435_v29 = vsub.f32 %v1413_v7, %v1433_v27  ;;  %v1436_v30 = vsub.f32 %v1416_v9, %v1433_v27  ;;  %v1437_v31 = vsub.f32 %v1418_v16, %v1433_v27 }
 0x58e   : > { %v1438_v32 = vmul.f32 %v1434_v28, %v1434_v28  ;;  %v1439_v33 = vmul.f32 %v1435_v29, %v1435_v29  ;;  %v1440_v34 = vmul.f32 %v1436_v30, %v1436_v30  ;;  %v1441_v24 = vmul.f32 %v1437_v31, %v1437_v31 }
 0x590   : > { %v1442_v35 = vsel %vm816_vm2, %v1438_v32, 0.0  ;;  %v1443_v36 = vsel %vm816_vm2, %v1439_v33, 0.0  ;;  %v1445_v38 = vsel %vm816_vm2, %v1440_v34, 0.0  ;;  %v1447_v40 = vsel %vm816_vm2, %v1441_v24, 0.0 }
 0x591   : > { %v1444_v37 = vadd.f32 %v1443_v36, %v1442_v35 }
 0x593   : > { %v1446_v39 = vadd.f32 %v1445_v38, %v1444_v37 }
 0x595   : > { %v1448_v41 = vadd.f32 %v1447_v40, %v1446_v39  ;;  %v1322_v40 = vperm.slane %v2972_v57, 3 }
 0x597   : > { %v1449_v42 = vrot.slane %v1448_v41, 4 }
 0x599   : > { %v1450_v44 = vadd.f32 %v1449_v42, %v1448_v41 }
 0x59b   : > { %v1451_v45 = vrot.slane %v1450_v44, 2 }
 0x59d   : > { %v1452_v46 = vadd.f32 %v1451_v45, %v1450_v44  ;;  %v2213_v44 = vld [vmem:[#allocation9 + $0x8] sm:$0xff] }
 0x59e   : > { %1607 = vmatpush.bf16.msrb.mxu2 %v2213_v44 }
 0x59f   : > { %v1453_v47 = vrot.slane %v1452_v46, 1 }
 0x5a1   : > { %v1454_v48 = vadd.f32 %v1453_v47, %v1452_v46 }
 0x5a3   : > { %v1455_v51 = vmul.f32 %v1454_v48, %v2917_v50  ;;  %v1473_v50 = vperm.slane %v2992_v4, 2 }
 0x5a5   : > { %v1456_v52 = vadd.f32 1e-05, %v1455_v51 }
 0x5a7   : > { %2372 = vrsqrt.f32 %v1456_v52  ;;  %vm1463_vm14 = vweird.f32 %v1456_v52 }
 0x5ad   : > { %v2373_v11 = vpop.eup %2372 }
 0x5ae   : > { %v1458_v53 = vmul.f32 %v2373_v11, %v1456_v52  ;;  %vm1464_vm13 = vweird.f32 %v2373_v11 }
 0x5af   : > { %vm1465_vm15 = vmor %vm1463_vm14, %vm1464_vm13 }
 0x5b0   : > { %v1459_v54 = vmul.f32 %v2373_v11, %v1458_v53 }
 0x5b2   : > { %v1460_v55 = vmul.f32 0.5, %v1459_v54 }
 0x5b4   : > { %v1461_v56 = vsub.f32 1.5, %v1460_v55 }
 0x5b6   : > { %v1462_v58 = vmul.f32 %v2373_v11, %v1461_v56 }
 0x5b8   : > { %v1466_v59 = vsel %vm1465_vm15, %v2373_v11, %v1462_v58 }
 0x5b9   : > { %v1467_v60 = vmul.f32 %v2992_v4, %v1466_v59 }
 0x5bb   : > { %v1468_v61 = vperm.slane %v1467_v60, 1 }
 0x5bd   : > { %v1469_v62 = vmul.f32 %v1468_v61, %v1434_v28  ;;  %v1470_v63 = vmul.f32 %v1468_v61, %v1435_v29  ;;  %v1472_v3 = vmul.f32 %v1468_v61, %v1437_v31  ;;  %v1471_v6 = vmul.f32 %v1468_v61, %v1436_v30 }
 0x5bf   : > { %v1474_v0 = vadd.f32 %v1473_v50, %v1469_v62  ;;  %v1475_v1 = vadd.f32 %v1473_v50, %v1470_v63  ;;  %v1477_v8 = vadd.f32 %v1473_v50, %v1472_v3  ;;  %v1476_v9 = vadd.f32 %v1473_v50, %v1471_v6  ;;  %v758_v63 = vld [vmem:[%s3095_s8] sm:$0xf]  ;;  %v2238_v3 = vld [vmem:[%s3135_s27 + $0x30] sm:$0xff]  ;;  %v2237_v6 = vld [vmem:[%s3135_s27 + $0x28] sm:$0xff] }
 0x5c1   : > { %2374 = vtanh.f32 %v1474_v0  ;;  %v2212_v0 = vld [vmem:[#allocation9] sm:$0xff] }
 0x5c2   : > { %2376 = vtanh.f32 %v1475_v1  ;;  %1608 = vmatpush.bf16.msrb.mxu2 %v2212_v0  ;;  %v2239_v1 = vld [vmem:[%s3135_s27 + $0x38] sm:$0xff] }
 0x5c3   : > { %2378 = vtanh.f32 %v1477_v8  ;;  %1733 = vmatpush.bf16.msrb.mxu1 %v2239_v1  ;;  %v2235_v8 = vld [vmem:[%s3135_s27 + $0x18] sm:$0xff] }
 0x5c4   : > { %2380 = vtanh.f32 %v1476_v9  ;;  %v2234_v9 = vld [vmem:[%s3135_s27 + $0x10] sm:$0xff] }
 0x5c7   : > { %v2375_v2 = vpop.eup %2374  ;;  %1734 = vmatpush.bf16.msrb.mxu1 %v2238_v3 }
 0x5c8   : > { %v2377_v5 = vpop.eup %2376 }
 0x5c9   : > { %v1482_v7 = vpack.c.bf16 %v2377_v5, %v2375_v2  ;;  %v2379_v12 = vpop.eup %2378  ;;  %v2241_v2 = vld [vmem:[#allocation11 + $0x8] sm:$0xff]  ;;  %v2240_v5 = vld [vmem:[#allocation11] sm:$0xff] }
 0x5ca   : > { %v2381_v43 = vpop.eup %2380  ;;  %1678 = vmatpush.bf16.msra.mxu2 %v2241_v2  ;;  %1762 = vmatpush.bf16.msrb.mxu3 %v2241_v2 }
 0x5cb   : > { %2142 = vmatmul.msk.bf16.vlgmr.msra.gmra.mxu3 %vm816_vm2, %v1482_v7  ;;  %v1483_v13 = vpack.c.bf16 %v2379_v12, %v2381_v43  ;;  %1735 = vmatpush.bf16.msrb.mxu1 %v2237_v6  ;;  %v2236_v7 = vld [vmem:[%s3135_s27 + $0x20] sm:$0xff] }
 0x5ce   : > { %1679 = vmatpush.bf16.msra.mxu2 %v2240_v5  ;;  %1763 = vmatpush.bf16.msrb.mxu3 %v2240_v5 }
 0x5cf   : > { %1736 = vmatpush.bf16.msrb.mxu1 %v2236_v7 }
 0x5d3   : > { %1737 = vmatpush.bf16.msrb.mxu1 %v2235_v8 }
 0x5d7   : > { %1738 = vmatpush.bf16.msrb.mxu1 %v2234_v9 }
 0x5db   : > { %2143 = vmatmul.msk.bf16.gmra.mxu3 %vm816_vm2, %v1483_v13  ;;  %v1350_v36 = vpop.f32.mrf.mxu2 }
 0x5dc   : > { %v1351_v47 = vadd.f32 %v1350_v36, %v1322_v40 }
 0x5e3   : > { %v1352_v37 = vpop.f32.mrf.mxu2 }
 0x5e4   : > { %v1353_v45 = vadd.f32 %v1352_v37, %v1322_v40 }
 0x5eb   : > { %v1355_v38 = vpop.f32.mrf.mxu2 }
 0x5ec   : > { %v1356_v42 = vadd.f32 %v1355_v38, %v1322_v40 }
 0x5f3   : > { %v1357_v39 = vpop.f32.mrf.mxu2 }
 0x5f4   : > { %v1358_v41 = vadd.f32 %v1357_v39, %v1322_v40 }
 0x64e   : > { %v1512_v15 = vpop.f32.mrf.mxu3 }
 0x64f   : > { %v1513_v16 = vadd.f32 %v1512_v15, %v1484_v14  ;;  %v1654_v15 = vld [vmem:[#allocation2] sm:$0xff] }
 0x651   : > { %2382 = vtanh.f32 %v1513_v16  ;;  %v1656_v16 = vpack.c.bf16 %v1654_v15, %v1654_v15 }
 0x656   : > { %v1514_v17 = vpop.f32.mrf.mxu3 }
 0x657   : > { %v1515_v18 = vadd.f32 %v1514_v17, %v1484_v14  ;;  %v2383_v19 = vpop.eup %2382  ;;  %v2232_v17 = vld [vmem:[%s3135_s27] sm:$0xff] }
 0x658   : > { %v1530_v20 = vpack.c.bf16 %v2383_v19, %v2383_v19 }
 0x659   : > { %2384 = vtanh.f32 %v1515_v18 }
 0x65a   : > { %v1548_v26 = vunpack.c.l.b16 %v1530_v20 }
 0x65e   : > { %v1517_v21 = vpop.f32.mrf.mxu3 }
 0x65f   : > { %v2385_v22 = vpop.eup %2384  ;;  %v1518_v25 = vadd.f32 %v1517_v21, %v1484_v14 }
 0x660   : > { %v1531_v23 = vpack.c.bf16 %v2385_v22, %v2385_v22 }
 0x661   : > { %2386 = vtanh.f32 %v1518_v25 }
 0x662   : > { %v1549_v27 = vunpack.c.l.b16 %v1531_v23 }
 0x664   : > { %v1552_v28 = vpack.c.b16 %v1549_v27, %v1548_v26 }
 0x666   : > { %v1519_v29 = vpop.f32.mrf.mxu3  ;;  %1554 = vrot.lane.b32.xlu0 %v1552_v28, %s2609_s30 }
 0x667   : > { %v1520_v4 = vadd.f32 %v1519_v29, %v1484_v14  ;;  %v2387_v30 = vpop.eup %2386  ;;  %v2233_v14 = vld [vmem:[%s3135_s27 + $0x8] sm:$0xff] }
 0x668   : > { %v1532_v31 = vpack.c.bf16 %v2387_v30, %v2387_v30  ;;  %1739 = vmatpush.bf16.msrb.mxu1 %v2233_v14  ;;  %v2323_v30 = vld [vmem:[%s3137_s20] ss:$0 sm:$0xff] }
 0x669   : > { %2388 = vtanh.f32 %v1520_v4 }
 0x66a   : > { %v1550_v34 = vunpack.c.l.b16 %v1532_v31  ;;  %2390 = vtanh.f32 %v1358_v41 }
 0x66b   : > { %2392 = vtanh.f32 %v1356_v42 }
 0x66c   : > { %2394 = vtanh.f32 %v1353_v45  ;;  %1740 = vmatpush.bf16.msrb.mxu1 %v2232_v17 }
 0x66d   : > { %2396 = vtanh.f32 %v1351_v47 }
 0x66f   : > { %v2389_v32 = vpop.eup %2388 }
 0x670   : > { %v1533_v33 = vpack.c.bf16 %v2389_v32, %v2389_v32  ;;  %v2391_v46 = vpop.eup %2390 }
 0x671   : > { %v2393_v48 = vpop.eup %2392  ;;  %v1529_v49 = vpack.c.bf16 %v2391_v46, %v2391_v46 }
 0x672   : > { %v1551_v24 = vunpack.c.l.b16 %v1533_v33  ;;  %v1528_v51 = vpack.c.bf16 %v2393_v48, %v2393_v48  ;;  %v2395_v52 = vpop.eup %2394 }
 0x673   : > { %v1541_v10 = vunpack.c.l.b16 %v1529_v49  ;;  %v2397_v53 = vpop.eup %2396  ;;  %v1527_v54 = vpack.c.bf16 %v2395_v52, %v2395_v52 }
 0x674   : > { %v1553_v35 = vpack.c.b16 %v1551_v24, %v1550_v34  ;;  %v1540_v11 = vunpack.c.l.b16 %v1528_v51  ;;  %v1526_v56 = vpack.c.bf16 %v2397_v53, %v2397_v53 }
 0x675   : > { %v1539_v59 = vunpack.c.l.b16 %v1527_v54 }
 0x676   : > { %1556 = vrot.lane.b32.xlu2 %v1553_v35, %s2609_s30  ;;  %v1543_v57 = vpack.c.b16 %v1541_v10, %v1540_v11  ;;  %v1538_v60 = vunpack.c.l.b16 %v1526_v56 }
 0x678   : > { %v1542_v61 = vpack.c.b16 %v1539_v59, %v1538_v60 }
 0x6d0   : > { %v1557_v55 = vpop.permute.xlu2 %1556 }
 0x6d1   : > { %v1564_v58 = vsel %vm816_vm2, %v1543_v57, %v1557_v55 }
 0x6d2   : > { %1575 = vmatpush.bf16.msra.mxu0 %v1564_v58 }
 0x6d8   : > { %v1555_v50 = vpop.permute.xlu0 %1554 }
 0x6d9   : > { %v1560_v62 = vsel %vm816_vm2, %v1542_v61, %v1555_v50 }
 0x6da   : > { %1576 = vmatpush.bf16.msra.mxu0 %v1560_v62 }
 0x6dd   : > { %2144 = vmatmul.msk.bf16.vlgmr.msra.gmra.mxu0 %vm816_vm2, %v758_v63 }
 0x6de   : > { %1626 = vmatpush.bf16.msrb.mxu0 %v2213_v44 }
 0x6e2   : > { %1627 = vmatpush.bf16.msrb.mxu0 %v2212_v0 }
 0x6e6   : > { %1769 = vmatpush.bf16.msra.mxu0 %v2239_v1 }
 0x6ea   : > { %1770 = vmatpush.bf16.msra.mxu0 %v2238_v3 }
 0x6ee   : > { %1771 = vmatpush.bf16.msra.mxu0 %v2237_v6 }
 0x6f2   : > { %1772 = vmatpush.bf16.msra.mxu0 %v2236_v7 }
 0x6f6   : > { %1773 = vmatpush.bf16.msra.mxu0 %v2235_v8 }
 0x6fa   : > { %1774 = vmatpush.bf16.msra.mxu0 %v2234_v9 }
 0x6fe   : > { %1775 = vmatpush.bf16.msra.mxu0 %v2233_v14 }
 0x702   : > { %1776 = vmatpush.bf16.msra.mxu0 %v2232_v17 }
 0x75a   : > { %v1578_v12 = vpop.f32.mrf.mxu0 }
 0x75b   : > { %v1582_v43 = vpack.c.bf16 %v1578_v12, %v1578_v12 }
 0x75d   : > { %2153 = vmatmul.msk.bf16.vlgmr.msrb.gmra.mxu2 %vm816_vm2, %v1582_v43  ;;  %1615 = vrot.lane.b32.xlu1 %v1582_v43, %s2610_s18  ;;  %s3136_s18 = sld [smem:[#allocation21_spill]] }
 0x762   : > { %v1580_v13 = vpop.f32.mrf.mxu0 }
 0x763   : > { %v2322_v19 = vld [vmem:[%s3136_s18] ss:$0 sm:$0xff] }
 0x76d   : > { %2163 = vmatmul.msk.bf16.vlgmr.msra.gmra.mxu2 %vm816_vm2, %v1656_v16 }
 0x7cf   : > { %v1616_v18 = vpop.permute.xlu1 %1615 }
 0x7d0   : > { %2154 = vmatmul.msk.bf16.vlgmr.msrb.gmra.mxu0 %vm816_vm2, %v1616_v18 }
 0x7e0   : > { %v1610_v20 = vpop.f32.mrf.mxu2 }
 0x7e1   : > { %v1611_v21 = vadd.f32 %v2322_v19, %v1610_v20 }
 0x7e3   : > { %v1655_v22 = vpack.c.bf16 %v1611_v21, %v1611_v21 }
 0x7e5   : > { %1741 = vmatmul.bf16.vlgmr.msrb.gmra.mxu1 %v1655_v22 }
 0x7e8   : > { %v1612_v23 = vpop.f32.mrf.mxu2 }
 0x7f0   : > { %v1681_v25 = vpop.f32.mrf.mxu2 }
 0x7f8   : > { %v1683_v26 = vpop.f32.mrf.mxu2 }
 0x84d   : > { %v1629_v27 = vpop.f32.mrf.mxu0 }
 0x84e   : > { %v1630_v28 = vadd.f32 %v2322_v19, %v1629_v27 }
 0x850   : > { %v1751_v29 = vpack.c.bf16 %v1630_v28, %v1630_v28 }
 0x852   : > { %1777 = vmatmul.bf16.vlgmr.msra.gmra.mxu0 %v1751_v29 }
 0x855   : > { %v1631_v4 = vpop.f32.mrf.mxu0 }
 0x862   : > { %v1742_v31 = vpop.f32.mrf.mxu1 }
 0x863   : > { %v1743_v32 = vadd.f32 %v1742_v31, %v1681_v25 }
 0x865   : > { %v1749_v33 = vadd.f32 %v2323_v30, %v1743_v32 }
 0x867   : > { %2398 = vtanh.f32 %v1749_v33 }
 0x86a   : > { %v1744_v34 = vpop.f32.mrf.mxu1 }
 0x86d   : > { %v2399_v24 = vpop.eup %2398 }
 0x86e   : > { %v1752_v35 = vpack.c.bf16 %v2399_v24, %v2399_v24 }
 0x870   : > { %2196 = vmatmul.msk.bf16.vlgmr.msrb.gmra.mxu3 %vm816_vm2, %v1752_v35 }
 0x8cf   : > { %v1778_v36 = vpop.f32.mrf.mxu0 }
 0x8d7   : > { %v1780_v37 = vpop.f32.mrf.mxu0 }
 0x8f3   : > { %v1765_v38 = vpop.f32.mrf.mxu3 }
 0x8f4   : > { %v1779_v39 = vadd.f32 %v1778_v36, %v1765_v38 }
 0x8f6   : > { %v1782_v40 = vadd.f32 %v2323_v30, %v1779_v39 }
 0x8f8   : > { %2400 = vtanh.f32 %v1782_v40 }
 0x8fb   : > { %v1767_v41 = vpop.f32.mrf.mxu3  ;;  %1788 = sbr.rel (%p2197_p1) target bundleno = 2469 (0x9a5), region = 112 }
 0x8fe   : > { %v2401_v42 = vpop.eup %2400 }
 0x8ff   : > { %1784 = vst.msk [vmem:[#allocation2] sm:$0xff] %vm816_vm2, %v2401_v42 }
 0x900   : > { %v1792_v44 = vld [vmem:[%s3138_s17 + $0x18] sm:$0xff]  ;;  %v1791_v45 = vld [vmem:[%s3138_s17 + $0x10] sm:$0xff]  ;;  %v1790_v46 = vld [vmem:[%s3138_s17 + $0x8] sm:$0xff] }
 0x901   : > { %1812 = vmatpush.msra.mxu0 %v1792_v44  ;;  %v1789_v47 = vld [vmem:[%s3138_s17] sm:$0xff]  ;;  %v2402_v48 = vld [vmem:[#allocation3] ss:$0 sm:$0xff] }
 0x903   : > { %1813 = vmatpush.msra.mxu0 %v1791_v45 }
 0x905   : > { %1814 = vmatpush.msra.mxu0 %v1790_v46 }
 0x907   : > { %1815 = vmatpush.msra.mxu0 %v1789_v47 }
 0x908   : > { %2198 = vmatmul.msk.f32.vlgmr.msra.gmra.mxu0 %vm816_vm2, %v2401_v42  ;;  %vm1839_vm2 = vcmask 7168  }
 0x985   : > { %v1817_v49 = vpop.f32.mrf.mxu0 }
 0x986   : > { %v1818_v51 = vadd.f32 %v2402_v48, %v1817_v49 }
 0x988   : > { %v2199_v10 = vmul.f32 -1.442695, %v1818_v51 }
 0x98a   : > { %2403 = vpow2.f32 %v2199_v10 }
 0x990   : > { %v2404_v52 = vpop.eup %2403 }
 0x991   : > { %v1823_v11 = vadd.f32 1.0, %v2404_v52 }
 0x993   : > { %2405 = vrcp.f32 %v1823_v11  ;;  %v1835_v55 = vand.u32 2147483648, %v1823_v11  ;;  %v1833_v58 = vand.u32 2147483647, %v1823_v11  ;;  %vm1829_vm1 = vweird.f32 %v1823_v11 }
 0x995   : > { %v1836_v60 = vor.u32 1.1754944e-38, %v1835_v55  ;;  %vm1834_vm4 = vcmp.eq.f32.partialorder %v1833_v58, 8.507059e+37 }
 0x999   : > { %v2406_v53 = vpop.eup %2405 }
 0x99a   : > { %v1825_v54 = vmul.f32 %v2406_v53, %v1823_v11  ;;  %vm1830_vm0 = vweird.f32 %v2406_v53 }
 0x99b   : > { %vm1831_vm3 = vmor %vm1829_vm1, %vm1830_vm0 }
 0x99c   : > { %v1826_v57 = vsub.f32 1.0, %v1825_v54 }
 0x99e   : > { %v1827_v56 = vmul.f32 %v2406_v53, %v1826_v57 }
 0x9a0   : > { %v1828_v59 = vadd.f32 %v2406_v53, %v1827_v56 }
 0x9a2   : > { %v1832_v61 = vsel %vm1831_vm3, %v2406_v53, %v1828_v59 }
 0x9a3   : > { %v1837_v50 = vsel %vm1834_vm4, %v1836_v60, %v1832_v61 }
 0x9a4   : > { %1840 = vst.msk [vmem:[%s3139_s22] sm:$0xff] %vm1839_vm2, %v1837_v50 }
 0x9a5 PF: > { %s3140_s26 = sld [smem:[#allocation16_spill]]  ;;  %s3143_s23 = smov %s2591_s24 }
 0x9a6   : > { %s3141_s25 = sld [smem:[#allocation15_spill]] }
 0x9a7   : > { %s3142_s0 = sld [smem:[#allocation17_spill]] }
 0x9ab   : > { %p32_p4 = scmp.ge.s32.totalorder %s3140_s26, 6  }
 0x9ac   : > { %s3144_s24 = smov %s3141_s25 }
 0x9ad   : > { %s3145_s25 = smov %s3142_s0  ;;  %34 = sbr.rel (!%p32_p4) target bundleno = 16 (0x10), region = 179 }
 0x9b2   :  { %1852 = vsyncpa [#allocation5], 1 }
 0x9b3   :  { %1854 = vsyncpa [#allocation5 + $0x1], 1 }
 0x9b4   :  { %1855 = vsyncpa [#allocation7], 1 }
 0x9b5   :  { %1857 = vsyncpa [#allocation7 + $0x1], 1 }
 0x9b6   :  { %1858 = vsyncpa [#allocation10], 1 }

</bundles_post_ra>
